<compile_context>
chip_gen: v7x
topology: tpu7x:2x2x1
jax: 0.10.0
libtpu: 0.0.40
codegen_flags: <defaults>
</compile_context>

<pallas_src>
import functools

import jax
import jax.numpy as jnp
from jax.experimental import pallas as pl
from jax.experimental.pallas import tpu as pltpu


def _round_up(x, m):
    return (x + m - 1) // m * m


def _vmem_estimate(t_chunk, b_blk, h_pad, ctx_itemsize):
    """Bytes of VMEM the pallas_call needs for its blocks + scratch."""
    gi_blk = t_chunk * b_blk * 4 * h_pad * 2          # bf16 gi stream, per buffer
    ctx_blk = b_blk * t_chunk * h_pad * ctx_itemsize  # ctx output, per buffer
    whh = h_pad * 4 * h_pad * 2                       # bf16 W_hh^T, single-buffered
    bias = 4 * h_pad * 4                              # f32 bias, single-buffered
    ht_ct = 2 * 2 * b_blk * h_pad * 4                 # h_T / c_T outputs (double-buffered)
    scratch = 2 * b_blk * h_pad * 4                   # h / c carries
    return 2 * gi_blk + 2 * ctx_blk + whh + bias + ht_ct + scratch


def _lstm_kernel(gi_ref, whh_ref, bias_ref,            # inputs
                 ctx_ref, ht_ref, ct_ref,               # outputs
                 h_scr, c_scr,                          # scratch
                 *, t_chunk, seq_len, seq_pad):
    chunk = pl.program_id(1)                            # time-chunk index (serial axis)
    H = h_scr.shape[-1]

    @pl.when(chunk == 0)
    def _():
        h_scr[...] = jnp.zeros_like(h_scr)
        c_scr[...] = jnp.zeros_like(c_scr)

    h = h_scr[...]                                      # (B_blk, H_pad) f32 hidden carry
    c = c_scr[...]                                      # (B_blk, H_pad) f32 cell carry
    whh = whh_ref[...]                                  # (H_pad, 4H_pad) bf16, VMEM-resident
    bias = bias_ref[...]                                # (1, 4H_pad) f32, added in f32 here

    # Short, static, fully-unrolled inner loop over the time chunk; one MXU op per step.
    for t in range(t_chunk):
        gi = gi_ref[t].astype(jnp.float32) + bias       # (B_blk, 4H_pad): x_t @ W_ih^T + b
        gh = jnp.dot(h.astype(jnp.bfloat16), whh,
                     preferred_element_type=jnp.float32)
        g = gi + gh                                     # gate preactivations [i, f, g, o]
        i_g = jax.nn.sigmoid(g[:, 0:H])
        f_g = jax.nn.sigmoid(g[:, H:2 * H])
        g_g = jnp.tanh(g[:, 2 * H:3 * H])
        o_g = jax.nn.sigmoid(g[:, 3 * H:4 * H])
        c_new = f_g * c + i_g * g_g
        h_new = o_g * jnp.tanh(c_new)

        if seq_pad != seq_len:                          # only traced when S was padded
            valid = (chunk * t_chunk + t) < seq_len
            c_new = jnp.where(valid, c_new, c)
            h_new = jnp.where(valid, h_new, h)

        # Batch-major ctx block (B_blk, t_chunk, H_pad): full-lane store at static sublane t.
        ctx_ref[:, t, :] = h_new.astype(ctx_ref.dtype)
        h, c = h_new, c_new

    h_scr[...] = h
    c_scr[...] = c

    # Final states written once, on the last time chunk of this batch block.
    @pl.when(chunk == pl.num_programs(1) - 1)
    def _():
        ht_ref[...] = h
        ct_ref[...] = c


def encoder_lstm_forward(tokens, emb_table, w_ih, w_hh, b_ih, b_hh,
                         w_e2d, b_e2d, *, t_chunk=None, ctx_dtype=jnp.float32):
    """EncoderLSTM forward.

    tokens:    (B, S) int32 token ids
    emb_table: (V, E) embedding table
    w_ih:      (4H, E)  LSTM weight_ih_l0   (gate order i, f, g, o)
    w_hh:      (4H, H)  LSTM weight_hh_l0
    b_ih,b_hh: (4H,)
    w_e2d:     (H, H)   encoder2decoder weight
    b_e2d:     (H,)

    Returns (ctx (B, S, H), decoder_init (B, H), c_T (B, H)).
    """
    B, S = tokens.shape
    V, E = emb_table.shape
    H = w_hh.shape[1]

    B_pad = _round_up(max(B, 8), 8)              # sublane-aligned batch
    H_pad = _round_up(max(H, 128), 128)          # lane-aligned hidden (gate slices on tile bounds)

    # Batch-parallel grid axis: 2 sublane-aligned batch blocks when the batch is big enough,
    # so v7x's two TensorCores each run half the batch.  Size 1 otherwise (harmless).
    n_b = 2 if B_pad >= 16 else 1
    B_blk = B_pad // n_b

    # ---- VMEM budget, t_chunk auto-sizing, and vmem_limit from actual block sizes ----------
    try:
        vmem_cap = int(getattr(pltpu.get_tpu_info(), "vmem_capacity_bytes", 64 << 20))
    except Exception:                            # pragma: no cover - defensive fallback
        vmem_cap = 64 << 20
    budget = int(vmem_cap * 0.75)

    ctx_itemsize = jnp.dtype(ctx_dtype).itemsize
    if t_chunk is None:
        t_chunk = 8
        for cand in (64, 48, 32, 24, 16, 8):     # largest chunk whose blocks fit the budget
            if _vmem_estimate(cand, B_blk, H_pad, ctx_itemsize) <= budget:
                t_chunk = cand
                break
    # ctx block puts t_chunk on the sublane dim -> keep it a multiple of 8.
    t_chunk = max(8, _round_up(min(int(t_chunk), max(S, 1)), 8))
    n_chunks = -(-S // t_chunk)
    S_pad = n_chunks * t_chunk

    needed = _vmem_estimate(t_chunk, B_blk, H_pad, ctx_itemsize)
    vmem_limit = int(min(max(needed + (16 << 20), 32 << 20), int(vmem_cap * 0.875)))

    # ---- gate-aware padding of parameters: each of the 4 gates padded H -> H_pad -----------
    def pad_gate_cols(w):                        # (rows, 4H) -> (rows, 4H_pad), zeros elsewhere
        rows = w.shape[0]
        out = jnp.zeros((rows, 4 * H_pad), jnp.float32)
        for g in range(4):
            out = out.at[:, g * H_pad:g * H_pad + H].set(
                w[:, g * H:(g + 1) * H].astype(jnp.float32))
        return out

    wihT = pad_gate_cols(jnp.transpose(w_ih))                        # (E, 4H_pad)
    whhT = jnp.zeros((H_pad, 4 * H_pad), jnp.float32)
    whhT = whhT.at[:H, :].set(pad_gate_cols(jnp.transpose(w_hh)))    # (H_pad, 4H_pad)
    bias = pad_gate_cols((b_ih + b_hh)[None, :])                     # (1, 4H_pad) f32 (in-kernel)

    # ---- batch padding + time-major token order (transpose the tiny int matrix only) -------
    tok = jnp.zeros((B_pad, S), tokens.dtype).at[:B, :].set(tokens)
    tok_tm = tok.T                                                   # (S, B_pad)

    # ---- hoisted input projection, streamed to the kernel in bf16 --------------------------
    wihT_bf = wihT.astype(jnp.bfloat16)
    if V <= S_pad * B_pad:
        # Small vocab: fold the projection into the embedding table, then gather projected rows.
        emb_proj = jnp.dot(emb_table.astype(jnp.bfloat16), wihT_bf,
                           preferred_element_type=jnp.float32).astype(jnp.bfloat16)  # (V, 4H_pad)
        gi = emb_proj[tok_tm]                                        # (S, B_pad, 4H_pad) bf16
    else:
        emb_tm = emb_table[tok_tm]                                   # (S, B_pad, E)
        gi = jnp.dot(emb_tm.reshape(S * B_pad, E).astype(jnp.bfloat16), wihT_bf,
                     preferred_element_type=jnp.float32).astype(jnp.bfloat16)
        gi = gi.reshape(S, B_pad, 4 * H_pad)
    if S_pad != S:
        gi = jnp.concatenate(
            [gi, jnp.zeros((S_pad - S, B_pad, 4 * H_pad), jnp.bfloat16)], axis=0)

    kernel = functools.partial(_lstm_kernel, t_chunk=t_chunk, seq_len=S, seq_pad=S_pad)

    ctx, h_t, c_t = pl.pallas_call(
        kernel,
        out_shape=(
            jax.ShapeDtypeStruct((B_pad, S_pad, H_pad), ctx_dtype),   # enc_h, batch-major
            jax.ShapeDtypeStruct((B_pad, H_pad), jnp.float32),        # h_T
            jax.ShapeDtypeStruct((B_pad, H_pad), jnp.float32),        # c_T
        ),
        grid_spec=pltpu.PrefetchScalarGridSpec(
            num_scalar_prefetch=0,
            grid=(n_b, n_chunks),
            in_specs=[
                pl.BlockSpec((t_chunk, B_blk, 4 * H_pad), lambda b, c: (c, b, 0)),  # gi stream
                pl.BlockSpec((H_pad, 4 * H_pad), lambda b, c: (0, 0),
                             pipeline_mode=pl.Buffered(1)),                         # W_hh^T
                pl.BlockSpec((1, 4 * H_pad), lambda b, c: (0, 0),
                             pipeline_mode=pl.Buffered(1)),                         # f32 bias
            ],
            out_specs=(
                pl.BlockSpec((B_blk, t_chunk, H_pad), lambda b, c: (b, c, 0)),
                pl.BlockSpec((B_blk, H_pad), lambda b, c: (b, 0)),
                pl.BlockSpec((B_blk, H_pad), lambda b, c: (b, 0)),
            ),
            scratch_shapes=[pltpu.VMEM((B_blk, H_pad), jnp.float32),   # h carry
                            pltpu.VMEM((B_blk, H_pad), jnp.float32)],  # c carry
        ),
        compiler_params=pltpu.CompilerParams(
            dimension_semantics=("parallel", "arbitrary"),   # batch parallel, time serial
            vmem_limit_bytes=vmem_limit),
    )(gi, whhT.astype(jnp.bfloat16), bias)

    # encoder2decoder tanh head on the final hidden state (tiny; done in f32 outside the
    # recurrence so W_e2d is not VMEM-resident for the whole sequence).
    h_t = h_t[:B, :H]
    decoder_init = jnp.tanh(jnp.dot(h_t, jnp.transpose(w_e2d)) + b_e2d)

    return ctx[:B, :S, :H], decoder_init, c_t[:B, :H]


def _reference_forward(tokens, emb_table, w_ih, w_hh, b_ih, b_hh, w_e2d, b_e2d):
    """Pure-JAX f32 reference of the PyTorch forward (for validation)."""
    B, S = tokens.shape
    H = w_hh.shape[1]
    emb = emb_table[tokens]                              # (B, S, E)

    def step(carry, x_t):
        h, c = carry
        g = x_t @ w_ih.T + b_ih + h @ w_hh.T + b_hh
        i = jax.nn.sigmoid(g[:, 0:H])
        f = jax.nn.sigmoid(g[:, H:2 * H])
        gg = jnp.tanh(g[:, 2 * H:3 * H])
        o = jax.nn.sigmoid(g[:, 3 * H:4 * H])
        c = f * c + i * gg
        h = o * jnp.tanh(c)
        return (h, c), h

    h0 = jnp.zeros((B, H), jnp.float32)
    c0 = jnp.zeros((B, H), jnp.float32)
    (h_t, c_t), hs = jax.lax.scan(step, (h0, c0), jnp.transpose(emb, (1, 0, 2)))
    ctx = jnp.transpose(hs, (1, 0, 2))
    dec = jnp.tanh(h_t @ w_e2d.T + b_e2d)
    return ctx, dec, c_t


if __name__ == "__main__":
    vocab_size, embedding_size, hidden_size = 50, 16, 32
    batch, seq = 2, 20                      # seq > t_chunk exercises chunking + time padding

    key = jax.random.PRNGKey(0)
    keys = jax.random.split(key, 8)
    emb_table = jax.random.normal(keys[0], (vocab_size, embedding_size), jnp.float32)
    bound = 1.0 / float(jnp.sqrt(hidden_size))
    w_ih = jax.random.uniform(keys[1], (4 * hidden_size, embedding_size), jnp.float32, -bound, bound)
    w_hh = jax.random.uniform(keys[2], (4 * hidden_size, hidden_size), jnp.float32, -bound, bound)
    b_ih = jax.random.uniform(keys[3], (4 * hidden_size,), jnp.float32, -bound, bound)
    b_hh = jax.random.uniform(keys[4], (4 * hidden_size,), jnp.float32, -bound, bound)
    w_e2d = jax.random.uniform(keys[5], (hidden_size, hidden_size), jnp.float32, -bound, bound)
    b_e2d = jax.random.uniform(keys[6], (hidden_size,), jnp.float32, -bound, bound)
    tokens = jax.random.randint(keys[7], (batch, seq), 1, vocab_size, dtype=jnp.int32)

    # Small explicit t_chunk at these tiny demo shapes so multiple grid steps are exercised;
    # the default (t_chunk=None) auto-sizes 16-64 against the VMEM budget at realistic shapes.
    ctx, dec_init, c_t = encoder_lstm_forward(
        tokens, emb_table, w_ih, w_hh, b_ih, b_hh, w_e2d, b_e2d, t_chunk=8)
    jax.block_until_ready((ctx, dec_init, c_t))

    assert ctx.shape == (batch, seq, hidden_size)
    assert dec_init.shape == (batch, hidden_size)
    assert c_t.shape == (batch, hidden_size)

    ctx_r, dec_r, c_r = _reference_forward(
        tokens, emb_table, w_ih, w_hh, b_ih, b_hh, w_e2d, b_e2d)
    err = max(float(jnp.max(jnp.abs(ctx - ctx_r))),
              float(jnp.max(jnp.abs(dec_init - dec_r))),
              float(jnp.max(jnp.abs(c_t - c_r))))
    assert err < 5e-2, f"max abs error vs reference: {err}"

    print("KERNEL_OK")
</pallas_src>

<mosaic_0001>
module attributes {stable_mosaic.version = 11 : i64} {
  func.func @_lstm_kernel(%arg0: i32, %arg1: i32, %arg2: memref<8x8x512xbf16, #tpu.memory_space<vmem>>, %arg3: memref<128x512xbf16, #tpu.memory_space<vmem>>, %arg4: memref<1x512xf32, #tpu.memory_space<vmem>>, %arg5: memref<8x8x128xf32, #tpu.memory_space<vmem>>, %arg6: memref<8x128xf32, #tpu.memory_space<vmem>>, %arg7: memref<8x128xf32, #tpu.memory_space<vmem>>, %arg8: memref<8x128xf32, #tpu.memory_space<vmem>>, %arg9: memref<8x128xf32, #tpu.memory_space<vmem>>) attributes {dimension_semantics = [#tpu.dimension_semantics<parallel>, #tpu.dimension_semantics<arbitrary>], iteration_bounds = array<i64: 1, 3>, scalar_prefetch = 0 : i64, scratch_operands = 2 : i64, tpu.core_type = #tpu.core_type<tc>, window_params = [{transform_indices = @transform_0, window_bounds = array<i64: 8, 8, 512>}, {pipeline_mode = #tpu.pipeline_mode<synchronous>, transform_indices = @transform_1, window_bounds = array<i64: 128, 512>}, {pipeline_mode = #tpu.pipeline_mode<synchronous>, transform_indices = @transform_2, window_bounds = array<i64: 1, 512>}, {transform_indices = @transform_3, window_bounds = array<i64: 8, 8, 128>}, {transform_indices = @transform_4, window_bounds = array<i64: 8, 128>}, {transform_indices = @transform_5, window_bounds = array<i64: 8, 128>}]} {
    %c0_i32 = arith.constant 0 : i32
    %0 = arith.cmpi eq, %arg1, %c0_i32 : i32
    %1 = arith.extui %0 : i1 to i32
    %c0_i32_0 = arith.constant 0 : i32
    %2 = arith.cmpi ne, %1, %c0_i32_0 : i32
    scf.if %2 {
      %cst_101 = arith.constant 0.000000e+00 : f32
      %340 = vector.broadcast %cst_101 : f32 to vector<8x128xf32>
      %c0_102 = arith.constant 0 : index
      %c0_103 = arith.constant 0 : index
      %341 = vector.load %arg8[%c0_102, %c0_103] : memref<8x128xf32, #tpu.memory_space<vmem>>, vector<8x128xf32>
      tpu.vector_store %arg8[%c0_102, %c0_103], %340 {strides = array<i32>} : memref<8x128xf32, #tpu.memory_space<vmem>>, vector<8x128xf32>,
      %cst_104 = arith.constant 0.000000e+00 : f32
      %342 = vector.broadcast %cst_104 : f32 to vector<8x128xf32>
      %c0_105 = arith.constant 0 : index
      %c0_106 = arith.constant 0 : index
      %343 = vector.load %arg9[%c0_105, %c0_106] : memref<8x128xf32, #tpu.memory_space<vmem>>, vector<8x128xf32>
      tpu.vector_store %arg9[%c0_105, %c0_106], %342 {strides = array<i32>} : memref<8x128xf32, #tpu.memory_space<vmem>>, vector<8x128xf32>,
    } else {
    }
    %c0 = arith.constant 0 : index
    %c0_1 = arith.constant 0 : index
    %3 = vector.load %arg8[%c0, %c0_1] : memref<8x128xf32, #tpu.memory_space<vmem>>, vector<8x128xf32>
    %c0_2 = arith.constant 0 : index
    %c0_3 = arith.constant 0 : index
    %4 = vector.load %arg9[%c0_2, %c0_3] : memref<8x128xf32, #tpu.memory_space<vmem>>, vector<8x128xf32>
    %c0_4 = arith.constant 0 : index
    %c0_5 = arith.constant 0 : index
    %5 = vector.load %arg3[%c0_4, %c0_5] : memref<128x512xbf16, #tpu.memory_space<vmem>>, vector<128x512xbf16>
    %c0_6 = arith.constant 0 : index
    %c0_7 = arith.constant 0 : index
    %6 = vector.load %arg4[%c0_6, %c0_7] : memref<1x512xf32, #tpu.memory_space<vmem>>, vector<1x512xf32>
    %c0_8 = arith.constant 0 : index
    %c0_9 = arith.constant 0 : index
    %c0_10 = arith.constant 0 : index
    %7 = vector.load %arg2[%c0_8, %c0_9, %c0_10] : memref<8x8x512xbf16, #tpu.memory_space<vmem>>, vector<1x8x512xbf16>
    %8 = vector.shape_cast %7 : vector<1x8x512xbf16> to vector<8x512xbf16>
    %9 = arith.extf %8 : vector<8x512xbf16> to vector<8x512xf32>
    %10 = vector.broadcast %6 : vector<1x512xf32> to vector<8x512xf32>
    %11 = arith.addf %9, %10 : vector<8x512xf32>
    %12 = arith.truncf %3 : vector<8x128xf32> to vector<8x128xbf16>
    %cst = arith.constant dense<0.000000e+00> : vector<8x512xf32>
    %13 = tpu.matmul %12, %5, %cst {dimension_numbers = #tpu.dot_dimension_numbers<[1], [0], [0], [1], [0, 0, 1, 1], [], []>} : vector<8x128xbf16>, vector<128x512xbf16>, vector<8x512xf32> -> vector<8x512xf32>
    %14 = arith.addf %11, %13 : vector<8x512xf32>
    %15 = vector.extract_strided_slice %14 {offsets = [0, 0], sizes = [8, 128], strides = [1, 1]} : vector<8x512xf32> to vector<8x128xf32>
    %16 = arith.negf %15 : vector<8x128xf32>
    %17 = math.exp %16 : vector<8x128xf32>
    %cst_11 = arith.constant 1.000000e+00 : f32
    %18 = vector.broadcast %cst_11 : f32 to vector<8x128xf32>
    %19 = arith.addf %18, %17 : vector<8x128xf32>
    %20 = arith.divf %18, %19 : vector<8x128xf32>
    %21 = vector.extract_strided_slice %14 {offsets = [0, 128], sizes = [8, 128], strides = [1, 1]} : vector<8x512xf32> to vector<8x128xf32>
    %22 = arith.negf %21 : vector<8x128xf32>
    %23 = math.exp %22 : vector<8x128xf32>
    %cst_12 = arith.constant 1.000000e+00 : f32
    %24 = vector.broadcast %cst_12 : f32 to vector<8x128xf32>
    %25 = arith.addf %24, %23 : vector<8x128xf32>
    %26 = arith.divf %24, %25 : vector<8x128xf32>
    %27 = vector.extract_strided_slice %14 {offsets = [0, 256], sizes = [8, 128], strides = [1, 1]} : vector<8x512xf32> to vector<8x128xf32>
    %28 = math.tanh %27 : vector<8x128xf32>
    %29 = vector.extract_strided_slice %14 {offsets = [0, 384], sizes = [8, 128], strides = [1, 1]} : vector<8x512xf32> to vector<8x128xf32>
    %30 = arith.negf %29 : vector<8x128xf32>
    %31 = math.exp %30 : vector<8x128xf32>
    %cst_13 = arith.constant 1.000000e+00 : f32
    %32 = vector.broadcast %cst_13 : f32 to vector<8x128xf32>
    %33 = arith.addf %32, %31 : vector<8x128xf32>
    %34 = arith.divf %32, %33 : vector<8x128xf32>
    %35 = arith.mulf %26, %4 : vector<8x128xf32>
    %36 = arith.mulf %20, %28 : vector<8x128xf32>
    %37 = arith.addf %35, %36 : vector<8x128xf32>
    %38 = math.tanh %37 : vector<8x128xf32>
    %39 = arith.mulf %34, %38 : vector<8x128xf32>
    %c8_i32 = arith.constant 8 : i32
    %40 = arith.muli %arg1, %c8_i32 : i32
    %c0_i32_14 = arith.constant 0 : i32
    %41 = arith.addi %40, %c0_i32_14 : i32
    %c20_i32 = arith.constant 20 : i32
    %42 = arith.cmpi slt, %41, %c20_i32 : i32
    %43 = arith.select %42, %37, %4 : vector<8x128xf32>
    %44 = arith.select %42, %39, %3 : vector<8x128xf32>
    %c0_15 = arith.constant 0 : index
    %c0_16 = arith.constant 0 : index
    %c0_17 = arith.constant 0 : index
    %45 = vector.load %arg5[%c0_15, %c0_16, %c0_17] : memref<8x8x128xf32, #tpu.memory_space<vmem>>, vector<8x1x128xf32>
    %46 = vector.shape_cast %45 : vector<8x1x128xf32> to vector<8x128xf32>
    %47 = vector.shape_cast %44 : vector<8x128xf32> to vector<8x1x128xf32>
    tpu.vector_store %arg5[%c0_15, %c0_16, %c0_17], %47 {strides = array<i32>} : memref<8x8x128xf32, #tpu.memory_space<vmem>>, vector<8x1x128xf32>,
    %c1 = arith.constant 1 : index
    %c0_18 = arith.constant 0 : index
    %c0_19 = arith.constant 0 : index
    %48 = vector.load %arg2[%c1, %c0_18, %c0_19] : memref<8x8x512xbf16, #tpu.memory_space<vmem>>, vector<1x8x512xbf16>
    %49 = vector.shape_cast %48 : vector<1x8x512xbf16> to vector<8x512xbf16>
    %50 = arith.extf %49 : vector<8x512xbf16> to vector<8x512xf32>
    %51 = vector.broadcast %6 : vector<1x512xf32> to vector<8x512xf32>
    %52 = arith.addf %50, %51 : vector<8x512xf32>
    %53 = arith.truncf %44 : vector<8x128xf32> to vector<8x128xbf16>
    %cst_20 = arith.constant dense<0.000000e+00> : vector<8x512xf32>
    %54 = tpu.matmul %53, %5, %cst_20 {dimension_numbers = #tpu.dot_dimension_numbers<[1], [0], [0], [1], [0, 0, 1, 1], [], []>} : vector<8x128xbf16>, vector<128x512xbf16>, vector<8x512xf32> -> vector<8x512xf32>
    %55 = arith.addf %52, %54 : vector<8x512xf32>
    %56 = vector.extract_strided_slice %55 {offsets = [0, 0], sizes = [8, 128], strides = [1, 1]} : vector<8x512xf32> to vector<8x128xf32>
    %57 = arith.negf %56 : vector<8x128xf32>
    %58 = math.exp %57 : vector<8x128xf32>
    %cst_21 = arith.constant 1.000000e+00 : f32
    %59 = vector.broadcast %cst_21 : f32 to vector<8x128xf32>
    %60 = arith.addf %59, %58 : vector<8x128xf32>
    %61 = arith.divf %59, %60 : vector<8x128xf32>
    %62 = vector.extract_strided_slice %55 {offsets = [0, 128], sizes = [8, 128], strides = [1, 1]} : vector<8x512xf32> to vector<8x128xf32>
    %63 = arith.negf %62 : vector<8x128xf32>
    %64 = math.exp %63 : vector<8x128xf32>
    %cst_22 = arith.constant 1.000000e+00 : f32
    %65 = vector.broadcast %cst_22 : f32 to vector<8x128xf32>
    %66 = arith.addf %65, %64 : vector<8x128xf32>
    %67 = arith.divf %65, %66 : vector<8x128xf32>
    %68 = vector.extract_strided_slice %55 {offsets = [0, 256], sizes = [8, 128], strides = [1, 1]} : vector<8x512xf32> to vector<8x128xf32>
    %69 = math.tanh %68 : vector<8x128xf32>
    %70 = vector.extract_strided_slice %55 {offsets = [0, 384], sizes = [8, 128], strides = [1, 1]} : vector<8x512xf32> to vector<8x128xf32>
    %71 = arith.negf %70 : vector<8x128xf32>
    %72 = math.exp %71 : vector<8x128xf32>
    %cst_23 = arith.constant 1.000000e+00 : f32
    %73 = vector.broadcast %cst_23 : f32 to vector<8x128xf32>
    %74 = arith.addf %73, %72 : vector<8x128xf32>
    %75 = arith.divf %73, %74 : vector<8x128xf32>
    %76 = arith.mulf %67, %43 : vector<8x128xf32>
    %77 = arith.mulf %61, %69 : vector<8x128xf32>
    %78 = arith.addf %76, %77 : vector<8x128xf32>
    %79 = math.tanh %78 : vector<8x128xf32>
    %80 = arith.mulf %75, %79 : vector<8x128xf32>
    %c8_i32_24 = arith.constant 8 : i32
    %81 = arith.muli %arg1, %c8_i32_24 : i32
    %c1_i32 = arith.constant 1 : i32
    %82 = arith.addi %81, %c1_i32 : i32
    %c20_i32_25 = arith.constant 20 : i32
    %83 = arith.cmpi slt, %82, %c20_i32_25 : i32
    %84 = arith.select %83, %78, %43 : vector<8x128xf32>
    %85 = arith.select %83, %80, %44 : vector<8x128xf32>
    %c0_26 = arith.constant 0 : index
    %c1_27 = arith.constant 1 : index
    %c0_28 = arith.constant 0 : index
    %86 = vector.load %arg5[%c0_26, %c1_27, %c0_28] : memref<8x8x128xf32, #tpu.memory_space<vmem>>, vector<8x1x128xf32>
    %87 = vector.shape_cast %86 : vector<8x1x128xf32> to vector<8x128xf32>
    %88 = vector.shape_cast %85 : vector<8x128xf32> to vector<8x1x128xf32>
    tpu.vector_store %arg5[%c0_26, %c1_27, %c0_28], %88 {strides = array<i32>} : memref<8x8x128xf32, #tpu.memory_space<vmem>>, vector<8x1x128xf32>,
    %c2 = arith.constant 2 : index
    %c0_29 = arith.constant 0 : index
    %c0_30 = arith.constant 0 : index
    %89 = vector.load %arg2[%c2, %c0_29, %c0_30] : memref<8x8x512xbf16, #tpu.memory_space<vmem>>, vector<1x8x512xbf16>
    %90 = vector.shape_cast %89 : vector<1x8x512xbf16> to vector<8x512xbf16>
    %91 = arith.extf %90 : vector<8x512xbf16> to vector<8x512xf32>
    %92 = vector.broadcast %6 : vector<1x512xf32> to vector<8x512xf32>
    %93 = arith.addf %91, %92 : vector<8x512xf32>
    %94 = arith.truncf %85 : vector<8x128xf32> to vector<8x128xbf16>
    %cst_31 = arith.constant dense<0.000000e+00> : vector<8x512xf32>
    %95 = tpu.matmul %94, %5, %cst_31 {dimension_numbers = #tpu.dot_dimension_numbers<[1], [0], [0], [1], [0, 0, 1, 1], [], []>} : vector<8x128xbf16>, vector<128x512xbf16>, vector<8x512xf32> -> vector<8x512xf32>
    %96 = arith.addf %93, %95 : vector<8x512xf32>
    %97 = vector.extract_strided_slice %96 {offsets = [0, 0], sizes = [8, 128], strides = [1, 1]} : vector<8x512xf32> to vector<8x128xf32>
    %98 = arith.negf %97 : vector<8x128xf32>
    %99 = math.exp %98 : vector<8x128xf32>
    %cst_32 = arith.constant 1.000000e+00 : f32
    %100 = vector.broadcast %cst_32 : f32 to vector<8x128xf32>
    %101 = arith.addf %100, %99 : vector<8x128xf32>
    %102 = arith.divf %100, %101 : vector<8x128xf32>
    %103 = vector.extract_strided_slice %96 {offsets = [0, 128], sizes = [8, 128], strides = [1, 1]} : vector<8x512xf32> to vector<8x128xf32>
    %104 = arith.negf %103 : vector<8x128xf32>
    %105 = math.exp %104 : vector<8x128xf32>
    %cst_33 = arith.constant 1.000000e+00 : f32
    %106 = vector.broadcast %cst_33 : f32 to vector<8x128xf32>
    %107 = arith.addf %106, %105 : vector<8x128xf32>
    %108 = arith.divf %106, %107 : vector<8x128xf32>
    %109 = vector.extract_strided_slice %96 {offsets = [0, 256], sizes = [8, 128], strides = [1, 1]} : vector<8x512xf32> to vector<8x128xf32>
    %110 = math.tanh %109 : vector<8x128xf32>
    %111 = vector.extract_strided_slice %96 {offsets = [0, 384], sizes = [8, 128], strides = [1, 1]} : vector<8x512xf32> to vector<8x128xf32>
    %112 = arith.negf %111 : vector<8x128xf32>
    %113 = math.exp %112 : vector<8x128xf32>
    %cst_34 = arith.constant 1.000000e+00 : f32
    %114 = vector.broadcast %cst_34 : f32 to vector<8x128xf32>
    %115 = arith.addf %114, %113 : vector<8x128xf32>
    %116 = arith.divf %114, %115 : vector<8x128xf32>
    %117 = arith.mulf %108, %84 : vector<8x128xf32>
    %118 = arith.mulf %102, %110 : vector<8x128xf32>
    %119 = arith.addf %117, %118 : vector<8x128xf32>
    %120 = math.tanh %119 : vector<8x128xf32>
    %121 = arith.mulf %116, %120 : vector<8x128xf32>
    %c8_i32_35 = arith.constant 8 : i32
    %122 = arith.muli %arg1, %c8_i32_35 : i32
    %c2_i32 = arith.constant 2 : i32
    %123 = arith.addi %122, %c2_i32 : i32
    %c20_i32_36 = arith.constant 20 : i32
    %124 = arith.cmpi slt, %123, %c20_i32_36 : i32
    %125 = arith.select %124, %119, %84 : vector<8x128xf32>
    %126 = arith.select %124, %121, %85 : vector<8x128xf32>
    %c0_37 = arith.constant 0 : index
    %c2_38 = arith.constant 2 : index
    %c0_39 = arith.constant 0 : index
    %127 = vector.load %arg5[%c0_37, %c2_38, %c0_39] : memref<8x8x128xf32, #tpu.memory_space<vmem>>, vector<8x1x128xf32>
    %128 = vector.shape_cast %127 : vector<8x1x128xf32> to vector<8x128xf32>
    %129 = vector.shape_cast %126 : vector<8x128xf32> to vector<8x1x128xf32>
    tpu.vector_store %arg5[%c0_37, %c2_38, %c0_39], %129 {strides = array<i32>} : memref<8x8x128xf32, #tpu.memory_space<vmem>>, vector<8x1x128xf32>,
    %c3 = arith.constant 3 : index
    %c0_40 = arith.constant 0 : index
    %c0_41 = arith.constant 0 : index
    %130 = vector.load %arg2[%c3, %c0_40, %c0_41] : memref<8x8x512xbf16, #tpu.memory_space<vmem>>, vector<1x8x512xbf16>
    %131 = vector.shape_cast %130 : vector<1x8x512xbf16> to vector<8x512xbf16>
    %132 = arith.extf %131 : vector<8x512xbf16> to vector<8x512xf32>
    %133 = vector.broadcast %6 : vector<1x512xf32> to vector<8x512xf32>
    %134 = arith.addf %132, %133 : vector<8x512xf32>
    %135 = arith.truncf %126 : vector<8x128xf32> to vector<8x128xbf16>
    %cst_42 = arith.constant dense<0.000000e+00> : vector<8x512xf32>
    %136 = tpu.matmul %135, %5, %cst_42 {dimension_numbers = #tpu.dot_dimension_numbers<[1], [0], [0], [1], [0, 0, 1, 1], [], []>} : vector<8x128xbf16>, vector<128x512xbf16>, vector<8x512xf32> -> vector<8x512xf32>
    %137 = arith.addf %134, %136 : vector<8x512xf32>
    %138 = vector.extract_strided_slice %137 {offsets = [0, 0], sizes = [8, 128], strides = [1, 1]} : vector<8x512xf32> to vector<8x128xf32>
    %139 = arith.negf %138 : vector<8x128xf32>
    %140 = math.exp %139 : vector<8x128xf32>
    %cst_43 = arith.constant 1.000000e+00 : f32
    %141 = vector.broadcast %cst_43 : f32 to vector<8x128xf32>
    %142 = arith.addf %141, %140 : vector<8x128xf32>
    %143 = arith.divf %141, %142 : vector<8x128xf32>
    %144 = vector.extract_strided_slice %137 {offsets = [0, 128], sizes = [8, 128], strides = [1, 1]} : vector<8x512xf32> to vector<8x128xf32>
    %145 = arith.negf %144 : vector<8x128xf32>
    %146 = math.exp %145 : vector<8x128xf32>
    %cst_44 = arith.constant 1.000000e+00 : f32
    %147 = vector.broadcast %cst_44 : f32 to vector<8x128xf32>
    %148 = arith.addf %147, %146 : vector<8x128xf32>
    %149 = arith.divf %147, %148 : vector<8x128xf32>
    %150 = vector.extract_strided_slice %137 {offsets = [0, 256], sizes = [8, 128], strides = [1, 1]} : vector<8x512xf32> to vector<8x128xf32>
    %151 = math.tanh %150 : vector<8x128xf32>
    %152 = vector.extract_strided_slice %137 {offsets = [0, 384], sizes = [8, 128], strides = [1, 1]} : vector<8x512xf32> to vector<8x128xf32>
    %153 = arith.negf %152 : vector<8x128xf32>
    %154 = math.exp %153 : vector<8x128xf32>
    %cst_45 = arith.constant 1.000000e+00 : f32
    %155 = vector.broadcast %cst_45 : f32 to vector<8x128xf32>
    %156 = arith.addf %155, %154 : vector<8x128xf32>
    %157 = arith.divf %155, %156 : vector<8x128xf32>
    %158 = arith.mulf %149, %125 : vector<8x128xf32>
    %159 = arith.mulf %143, %151 : vector<8x128xf32>
    %160 = arith.addf %158, %159 : vector<8x128xf32>
    %161 = math.tanh %160 : vector<8x128xf32>
    %162 = arith.mulf %157, %161 : vector<8x128xf32>
    %c8_i32_46 = arith.constant 8 : i32
    %163 = arith.muli %arg1, %c8_i32_46 : i32
    %c3_i32 = arith.constant 3 : i32
    %164 = arith.addi %163, %c3_i32 : i32
    %c20_i32_47 = arith.constant 20 : i32
    %165 = arith.cmpi slt, %164, %c20_i32_47 : i32
    %166 = arith.select %165, %160, %125 : vector<8x128xf32>
    %167 = arith.select %165, %162, %126 : vector<8x128xf32>
    %c0_48 = arith.constant 0 : index
    %c3_49 = arith.constant 3 : index
    %c0_50 = arith.constant 0 : index
    %168 = vector.load %arg5[%c0_48, %c3_49, %c0_50] : memref<8x8x128xf32, #tpu.memory_space<vmem>>, vector<8x1x128xf32>
    %169 = vector.shape_cast %168 : vector<8x1x128xf32> to vector<8x128xf32>
    %170 = vector.shape_cast %167 : vector<8x128xf32> to vector<8x1x128xf32>
    tpu.vector_store %arg5[%c0_48, %c3_49, %c0_50], %170 {strides = array<i32>} : memref<8x8x128xf32, #tpu.memory_space<vmem>>, vector<8x1x128xf32>,
    %c4 = arith.constant 4 : index
    %c0_51 = arith.constant 0 : index
    %c0_52 = arith.constant 0 : index
    %171 = vector.load %arg2[%c4, %c0_51, %c0_52] : memref<8x8x512xbf16, #tpu.memory_space<vmem>>, vector<1x8x512xbf16>
    %172 = vector.shape_cast %171 : vector<1x8x512xbf16> to vector<8x512xbf16>
    %173 = arith.extf %172 : vector<8x512xbf16> to vector<8x512xf32>
    %174 = vector.broadcast %6 : vector<1x512xf32> to vector<8x512xf32>
    %175 = arith.addf %173, %174 : vector<8x512xf32>
    %176 = arith.truncf %167 : vector<8x128xf32> to vector<8x128xbf16>
    %cst_53 = arith.constant dense<0.000000e+00> : vector<8x512xf32>
    %177 = tpu.matmul %176, %5, %cst_53 {dimension_numbers = #tpu.dot_dimension_numbers<[1], [0], [0], [1], [0, 0, 1, 1], [], []>} : vector<8x128xbf16>, vector<128x512xbf16>, vector<8x512xf32> -> vector<8x512xf32>
    %178 = arith.addf %175, %177 : vector<8x512xf32>
    %179 = vector.extract_strided_slice %178 {offsets = [0, 0], sizes = [8, 128], strides = [1, 1]} : vector<8x512xf32> to vector<8x128xf32>
    %180 = arith.negf %179 : vector<8x128xf32>
    %181 = math.exp %180 : vector<8x128xf32>
    %cst_54 = arith.constant 1.000000e+00 : f32
    %182 = vector.broadcast %cst_54 : f32 to vector<8x128xf32>
    %183 = arith.addf %182, %181 : vector<8x128xf32>
    %184 = arith.divf %182, %183 : vector<8x128xf32>
    %185 = vector.extract_strided_slice %178 {offsets = [0, 128], sizes = [8, 128], strides = [1, 1]} : vector<8x512xf32> to vector<8x128xf32>
    %186 = arith.negf %185 : vector<8x128xf32>
    %187 = math.exp %186 : vector<8x128xf32>
    %cst_55 = arith.constant 1.000000e+00 : f32
    %188 = vector.broadcast %cst_55 : f32 to vector<8x128xf32>
    %189 = arith.addf %188, %187 : vector<8x128xf32>
    %190 = arith.divf %188, %189 : vector<8x128xf32>
    %191 = vector.extract_strided_slice %178 {offsets = [0, 256], sizes = [8, 128], strides = [1, 1]} : vector<8x512xf32> to vector<8x128xf32>
    %192 = math.tanh %191 : vector<8x128xf32>
    %193 = vector.extract_strided_slice %178 {offsets = [0, 384], sizes = [8, 128], strides = [1, 1]} : vector<8x512xf32> to vector<8x128xf32>
    %194 = arith.negf %193 : vector<8x128xf32>
    %195 = math.exp %194 : vector<8x128xf32>
    %cst_56 = arith.constant 1.000000e+00 : f32
    %196 = vector.broadcast %cst_56 : f32 to vector<8x128xf32>
    %197 = arith.addf %196, %195 : vector<8x128xf32>
    %198 = arith.divf %196, %197 : vector<8x128xf32>
    %199 = arith.mulf %190, %166 : vector<8x128xf32>
    %200 = arith.mulf %184, %192 : vector<8x128xf32>
    %201 = arith.addf %199, %200 : vector<8x128xf32>
    %202 = math.tanh %201 : vector<8x128xf32>
    %203 = arith.mulf %198, %202 : vector<8x128xf32>
    %c8_i32_57 = arith.constant 8 : i32
    %204 = arith.muli %arg1, %c8_i32_57 : i32
    %c4_i32 = arith.constant 4 : i32
    %205 = arith.addi %204, %c4_i32 : i32
    %c20_i32_58 = arith.constant 20 : i32
    %206 = arith.cmpi slt, %205, %c20_i32_58 : i32
    %207 = arith.select %206, %201, %166 : vector<8x128xf32>
    %208 = arith.select %206, %203, %167 : vector<8x128xf32>
    %c0_59 = arith.constant 0 : index
    %c4_60 = arith.constant 4 : index
    %c0_61 = arith.constant 0 : index
    %209 = vector.load %arg5[%c0_59, %c4_60, %c0_61] : memref<8x8x128xf32, #tpu.memory_space<vmem>>, vector<8x1x128xf32>
    %210 = vector.shape_cast %209 : vector<8x1x128xf32> to vector<8x128xf32>
    %211 = vector.shape_cast %208 : vector<8x128xf32> to vector<8x1x128xf32>
    tpu.vector_store %arg5[%c0_59, %c4_60, %c0_61], %211 {strides = array<i32>} : memref<8x8x128xf32, #tpu.memory_space<vmem>>, vector<8x1x128xf32>,
    %c5 = arith.constant 5 : index
    %c0_62 = arith.constant 0 : index
    %c0_63 = arith.constant 0 : index
    %212 = vector.load %arg2[%c5, %c0_62, %c0_63] : memref<8x8x512xbf16, #tpu.memory_space<vmem>>, vector<1x8x512xbf16>
    %213 = vector.shape_cast %212 : vector<1x8x512xbf16> to vector<8x512xbf16>
    %214 = arith.extf %213 : vector<8x512xbf16> to vector<8x512xf32>
    %215 = vector.broadcast %6 : vector<1x512xf32> to vector<8x512xf32>
    %216 = arith.addf %214, %215 : vector<8x512xf32>
    %217 = arith.truncf %208 : vector<8x128xf32> to vector<8x128xbf16>
    %cst_64 = arith.constant dense<0.000000e+00> : vector<8x512xf32>
    %218 = tpu.matmul %217, %5, %cst_64 {dimension_numbers = #tpu.dot_dimension_numbers<[1], [0], [0], [1], [0, 0, 1, 1], [], []>} : vector<8x128xbf16>, vector<128x512xbf16>, vector<8x512xf32> -> vector<8x512xf32>
    %219 = arith.addf %216, %218 : vector<8x512xf32>
    %220 = vector.extract_strided_slice %219 {offsets = [0, 0], sizes = [8, 128], strides = [1, 1]} : vector<8x512xf32> to vector<8x128xf32>
    %221 = arith.negf %220 : vector<8x128xf32>
    %222 = math.exp %221 : vector<8x128xf32>
    %cst_65 = arith.constant 1.000000e+00 : f32
    %223 = vector.broadcast %cst_65 : f32 to vector<8x128xf32>
    %224 = arith.addf %223, %222 : vector<8x128xf32>
    %225 = arith.divf %223, %224 : vector<8x128xf32>
    %226 = vector.extract_strided_slice %219 {offsets = [0, 128], sizes = [8, 128], strides = [1, 1]} : vector<8x512xf32> to vector<8x128xf32>
    %227 = arith.negf %226 : vector<8x128xf32>
    %228 = math.exp %227 : vector<8x128xf32>
    %cst_66 = arith.constant 1.000000e+00 : f32
    %229 = vector.broadcast %cst_66 : f32 to vector<8x128xf32>
    %230 = arith.addf %229, %228 : vector<8x128xf32>
    %231 = arith.divf %229, %230 : vector<8x128xf32>
    %232 = vector.extract_strided_slice %219 {offsets = [0, 256], sizes = [8, 128], strides = [1, 1]} : vector<8x512xf32> to vector<8x128xf32>
    %233 = math.tanh %232 : vector<8x128xf32>
    %234 = vector.extract_strided_slice %219 {offsets = [0, 384], sizes = [8, 128], strides = [1, 1]} : vector<8x512xf32> to vector<8x128xf32>
    %235 = arith.negf %234 : vector<8x128xf32>
    %236 = math.exp %235 : vector<8x128xf32>
    %cst_67 = arith.constant 1.000000e+00 : f32
    %237 = vector.broadcast %cst_67 : f32 to vector<8x128xf32>
    %238 = arith.addf %237, %236 : vector<8x128xf32>
    %239 = arith.divf %237, %238 : vector<8x128xf32>
    %240 = arith.mulf %231, %207 : vector<8x128xf32>
    %241 = arith.mulf %225, %233 : vector<8x128xf32>
    %242 = arith.addf %240, %241 : vector<8x128xf32>
    %243 = math.tanh %242 : vector<8x128xf32>
    %244 = arith.mulf %239, %243 : vector<8x128xf32>
    %c8_i32_68 = arith.constant 8 : i32
    %245 = arith.muli %arg1, %c8_i32_68 : i32
    %c5_i32 = arith.constant 5 : i32
    %246 = arith.addi %245, %c5_i32 : i32
    %c20_i32_69 = arith.constant 20 : i32
    %247 = arith.cmpi slt, %246, %c20_i32_69 : i32
    %248 = arith.select %247, %242, %207 : vector<8x128xf32>
    %249 = arith.select %247, %244, %208 : vector<8x128xf32>
    %c0_70 = arith.constant 0 : index
    %c5_71 = arith.constant 5 : index
    %c0_72 = arith.constant 0 : index
    %250 = vector.load %arg5[%c0_70, %c5_71, %c0_72] : memref<8x8x128xf32, #tpu.memory_space<vmem>>, vector<8x1x128xf32>
    %251 = vector.shape_cast %250 : vector<8x1x128xf32> to vector<8x128xf32>
    %252 = vector.shape_cast %249 : vector<8x128xf32> to vector<8x1x128xf32>
    tpu.vector_store %arg5[%c0_70, %c5_71, %c0_72], %252 {strides = array<i32>} : memref<8x8x128xf32, #tpu.memory_space<vmem>>, vector<8x1x128xf32>,
    %c6 = arith.constant 6 : index
    %c0_73 = arith.constant 0 : index
    %c0_74 = arith.constant 0 : index
    %253 = vector.load %arg2[%c6, %c0_73, %c0_74] : memref<8x8x512xbf16, #tpu.memory_space<vmem>>, vector<1x8x512xbf16>
    %254 = vector.shape_cast %253 : vector<1x8x512xbf16> to vector<8x512xbf16>
    %255 = arith.extf %254 : vector<8x512xbf16> to vector<8x512xf32>
    %256 = vector.broadcast %6 : vector<1x512xf32> to vector<8x512xf32>
    %257 = arith.addf %255, %256 : vector<8x512xf32>
    %258 = arith.truncf %249 : vector<8x128xf32> to vector<8x128xbf16>
    %cst_75 = arith.constant dense<0.000000e+00> : vector<8x512xf32>
    %259 = tpu.matmul %258, %5, %cst_75 {dimension_numbers = #tpu.dot_dimension_numbers<[1], [0], [0], [1], [0, 0, 1, 1], [], []>} : vector<8x128xbf16>, vector<128x512xbf16>, vector<8x512xf32> -> vector<8x512xf32>
    %260 = arith.addf %257, %259 : vector<8x512xf32>
    %261 = vector.extract_strided_slice %260 {offsets = [0, 0], sizes = [8, 128], strides = [1, 1]} : vector<8x512xf32> to vector<8x128xf32>
    %262 = arith.negf %261 : vector<8x128xf32>
    %263 = math.exp %262 : vector<8x128xf32>
    %cst_76 = arith.constant 1.000000e+00 : f32
    %264 = vector.broadcast %cst_76 : f32 to vector<8x128xf32>
    %265 = arith.addf %264, %263 : vector<8x128xf32>
    %266 = arith.divf %264, %265 : vector<8x128xf32>
    %267 = vector.extract_strided_slice %260 {offsets = [0, 128], sizes = [8, 128], strides = [1, 1]} : vector<8x512xf32> to vector<8x128xf32>
    %268 = arith.negf %267 : vector<8x128xf32>
    %269 = math.exp %268 : vector<8x128xf32>
    %cst_77 = arith.constant 1.000000e+00 : f32
    %270 = vector.broadcast %cst_77 : f32 to vector<8x128xf32>
    %271 = arith.addf %270, %269 : vector<8x128xf32>
    %272 = arith.divf %270, %271 : vector<8x128xf32>
    %273 = vector.extract_strided_slice %260 {offsets = [0, 256], sizes = [8, 128], strides = [1, 1]} : vector<8x512xf32> to vector<8x128xf32>
    %274 = math.tanh %273 : vector<8x128xf32>
    %275 = vector.extract_strided_slice %260 {offsets = [0, 384], sizes = [8, 128], strides = [1, 1]} : vector<8x512xf32> to vector<8x128xf32>
    %276 = arith.negf %275 : vector<8x128xf32>
    %277 = math.exp %276 : vector<8x128xf32>
    %cst_78 = arith.constant 1.000000e+00 : f32
    %278 = vector.broadcast %cst_78 : f32 to vector<8x128xf32>
    %279 = arith.addf %278, %277 : vector<8x128xf32>
    %280 = arith.divf %278, %279 : vector<8x128xf32>
    %281 = arith.mulf %272, %248 : vector<8x128xf32>
    %282 = arith.mulf %266, %274 : vector<8x128xf32>
    %283 = arith.addf %281, %282 : vector<8x128xf32>
    %284 = math.tanh %283 : vector<8x128xf32>
    %285 = arith.mulf %280, %284 : vector<8x128xf32>
    %c8_i32_79 = arith.constant 8 : i32
    %286 = arith.muli %arg1, %c8_i32_79 : i32
    %c6_i32 = arith.constant 6 : i32
    %287 = arith.addi %286, %c6_i32 : i32
    %c20_i32_80 = arith.constant 20 : i32
    %288 = arith.cmpi slt, %287, %c20_i32_80 : i32
    %289 = arith.select %288, %283, %248 : vector<8x128xf32>
    %290 = arith.select %288, %285, %249 : vector<8x128xf32>
    %c0_81 = arith.constant 0 : index
    %c6_82 = arith.constant 6 : index
    %c0_83 = arith.constant 0 : index
    %291 = vector.load %arg5[%c0_81, %c6_82, %c0_83] : memref<8x8x128xf32, #tpu.memory_space<vmem>>, vector<8x1x128xf32>
    %292 = vector.shape_cast %291 : vector<8x1x128xf32> to vector<8x128xf32>
    %293 = vector.shape_cast %290 : vector<8x128xf32> to vector<8x1x128xf32>
    tpu.vector_store %arg5[%c0_81, %c6_82, %c0_83], %293 {strides = array<i32>} : memref<8x8x128xf32, #tpu.memory_space<vmem>>, vector<8x1x128xf32>,
    %c7 = arith.constant 7 : index
    %c0_84 = arith.constant 0 : index
    %c0_85 = arith.constant 0 : index
    %294 = vector.load %arg2[%c7, %c0_84, %c0_85] : memref<8x8x512xbf16, #tpu.memory_space<vmem>>, vector<1x8x512xbf16>
    %295 = vector.shape_cast %294 : vector<1x8x512xbf16> to vector<8x512xbf16>
    %296 = arith.extf %295 : vector<8x512xbf16> to vector<8x512xf32>
    %297 = vector.broadcast %6 : vector<1x512xf32> to vector<8x512xf32>
    %298 = arith.addf %296, %297 : vector<8x512xf32>
    %299 = arith.truncf %290 : vector<8x128xf32> to vector<8x128xbf16>
    %cst_86 = arith.constant dense<0.000000e+00> : vector<8x512xf32>
    %300 = tpu.matmul %299, %5, %cst_86 {dimension_numbers = #tpu.dot_dimension_numbers<[1], [0], [0], [1], [0, 0, 1, 1], [], []>} : vector<8x128xbf16>, vector<128x512xbf16>, vector<8x512xf32> -> vector<8x512xf32>
    %301 = arith.addf %298, %300 : vector<8x512xf32>
    %302 = vector.extract_strided_slice %301 {offsets = [0, 0], sizes = [8, 128], strides = [1, 1]} : vector<8x512xf32> to vector<8x128xf32>
    %303 = arith.negf %302 : vector<8x128xf32>
    %304 = math.exp %303 : vector<8x128xf32>
    %cst_87 = arith.constant 1.000000e+00 : f32
    %305 = vector.broadcast %cst_87 : f32 to vector<8x128xf32>
    %306 = arith.addf %305, %304 : vector<8x128xf32>
    %307 = arith.divf %305, %306 : vector<8x128xf32>
    %308 = vector.extract_strided_slice %301 {offsets = [0, 128], sizes = [8, 128], strides = [1, 1]} : vector<8x512xf32> to vector<8x128xf32>
    %309 = arith.negf %308 : vector<8x128xf32>
    %310 = math.exp %309 : vector<8x128xf32>
    %cst_88 = arith.constant 1.000000e+00 : f32
    %311 = vector.broadcast %cst_88 : f32 to vector<8x128xf32>
    %312 = arith.addf %311, %310 : vector<8x128xf32>
    %313 = arith.divf %311, %312 : vector<8x128xf32>
    %314 = vector.extract_strided_slice %301 {offsets = [0, 256], sizes = [8, 128], strides = [1, 1]} : vector<8x512xf32> to vector<8x128xf32>
    %315 = math.tanh %314 : vector<8x128xf32>
    %316 = vector.extract_strided_slice %301 {offsets = [0, 384], sizes = [8, 128], strides = [1, 1]} : vector<8x512xf32> to vector<8x128xf32>
    %317 = arith.negf %316 : vector<8x128xf32>
    %318 = math.exp %317 : vector<8x128xf32>
    %cst_89 = arith.constant 1.000000e+00 : f32
    %319 = vector.broadcast %cst_89 : f32 to vector<8x128xf32>
    %320 = arith.addf %319, %318 : vector<8x128xf32>
    %321 = arith.divf %319, %320 : vector<8x128xf32>
    %322 = arith.mulf %313, %289 : vector<8x128xf32>
    %323 = arith.mulf %307, %315 : vector<8x128xf32>
    %324 = arith.addf %322, %323 : vector<8x128xf32>
    %325 = math.tanh %324 : vector<8x128xf32>
    %326 = arith.mulf %321, %325 : vector<8x128xf32>
    %c8_i32_90 = arith.constant 8 : i32
    %327 = arith.muli %arg1, %c8_i32_90 : i32
    %c7_i32 = arith.constant 7 : i32
    %328 = arith.addi %327, %c7_i32 : i32
    %c20_i32_91 = arith.constant 20 : i32
    %329 = arith.cmpi slt, %328, %c20_i32_91 : i32
    %330 = arith.select %329, %324, %289 : vector<8x128xf32>
    %331 = arith.select %329, %326, %290 : vector<8x128xf32>
    %c0_92 = arith.constant 0 : index
    %c7_93 = arith.constant 7 : index
    %c0_94 = arith.constant 0 : index
    %332 = vector.load %arg5[%c0_92, %c7_93, %c0_94] : memref<8x8x128xf32, #tpu.memory_space<vmem>>, vector<8x1x128xf32>
    %333 = vector.shape_cast %332 : vector<8x1x128xf32> to vector<8x128xf32>
    %334 = vector.shape_cast %331 : vector<8x128xf32> to vector<8x1x128xf32>
    tpu.vector_store %arg5[%c0_92, %c7_93, %c0_94], %334 {strides = array<i32>} : memref<8x8x128xf32, #tpu.memory_space<vmem>>, vector<8x1x128xf32>,
    %c0_95 = arith.constant 0 : index
    %c0_96 = arith.constant 0 : index
    %335 = vector.load %arg8[%c0_95, %c0_96] : memref<8x128xf32, #tpu.memory_space<vmem>>, vector<8x128xf32>
    tpu.vector_store %arg8[%c0_95, %c0_96], %331 {strides = array<i32>} : memref<8x128xf32, #tpu.memory_space<vmem>>, vector<8x128xf32>,
    %c0_97 = arith.constant 0 : index
    %c0_98 = arith.constant 0 : index
    %336 = vector.load %arg9[%c0_97, %c0_98] : memref<8x128xf32, #tpu.memory_space<vmem>>, vector<8x128xf32>
    tpu.vector_store %arg9[%c0_97, %c0_98], %330 {strides = array<i32>} : memref<8x128xf32, #tpu.memory_space<vmem>>, vector<8x128xf32>,
    %c2_i32_99 = arith.constant 2 : i32
    %337 = arith.cmpi eq, %arg1, %c2_i32_99 : i32
    %338 = arith.extui %337 : i1 to i32
    %c0_i32_100 = arith.constant 0 : i32
    %339 = arith.cmpi ne, %338, %c0_i32_100 : i32
    scf.if %339 {
      %c0_101 = arith.constant 0 : index
      %c0_102 = arith.constant 0 : index
      %340 = vector.load %arg6[%c0_101, %c0_102] : memref<8x128xf32, #tpu.memory_space<vmem>>, vector<8x128xf32>
      tpu.vector_store %arg6[%c0_101, %c0_102], %331 {strides = array<i32>} : memref<8x128xf32, #tpu.memory_space<vmem>>, vector<8x128xf32>,
      %c0_103 = arith.constant 0 : index
      %c0_104 = arith.constant 0 : index
      %341 = vector.load %arg7[%c0_103, %c0_104] : memref<8x128xf32, #tpu.memory_space<vmem>>, vector<8x128xf32>
      tpu.vector_store %arg7[%c0_103, %c0_104], %330 {strides = array<i32>} : memref<8x128xf32, #tpu.memory_space<vmem>>, vector<8x128xf32>,
    } else {
    }
    return
  }
  func.func @transform_0(%arg0: i32, %arg1: i32) -> (i32, i32, i32) {
    %c0_i32 = arith.constant 0 : i32
    %c0_i32_0 = arith.constant 0 : i32
    return %arg1, %arg0, %c0_i32 : i32, i32, i32
  }
  func.func @transform_1(%arg0: i32, %arg1: i32) -> (i32, i32) {
    %c0_i32 = arith.constant 0 : i32
    %c0_i32_0 = arith.constant 0 : i32
    %c0_i32_1 = arith.constant 0 : i32
    return %c0_i32, %c0_i32_0 : i32, i32
  }
  func.func @transform_2(%arg0: i32, %arg1: i32) -> (i32, i32) {
    %c0_i32 = arith.constant 0 : i32
    %c0_i32_0 = arith.constant 0 : i32
    %c0_i32_1 = arith.constant 0 : i32
    return %c0_i32, %c0_i32_0 : i32, i32
  }
  func.func @transform_3(%arg0: i32, %arg1: i32) -> (i32, i32, i32) {
    %c0_i32 = arith.constant 0 : i32
    %c0_i32_0 = arith.constant 0 : i32
    return %arg0, %arg1, %c0_i32 : i32, i32, i32
  }
  func.func @transform_4(%arg0: i32, %arg1: i32) -> (i32, i32) {
    %c0_i32 = arith.constant 0 : i32
    %c0_i32_0 = arith.constant 0 : i32
    return %arg0, %c0_i32 : i32, i32
  }
  func.func @transform_5(%arg0: i32, %arg1: i32) -> (i32, i32) {
    %c0_i32 = arith.constant 0 : i32
    %c0_i32_0 = arith.constant 0 : i32
    return %arg0, %c0_i32 : i32, i32
  }
}

</mosaic_0001>

<bundles_post_ra>
// kernel: tpu_custom_call.1
= control target key start
LH: loop header
LB: loop body
LE: loop exit
PB: predicated region body
PF: predicated region fallthrough
CT: control target
= control target key end

     0   :  { %11 = vsyncpa [#allocation5], 0  ;;  %s3865_s0 = inlined_call_operand.hbm [shape: bf16[24,8,512], index: 0, kind: input, shape index: {}]   ;;  %s3866_s1 = inlined_call_operand.hbm [shape: bf16[128,512], index: 1, kind: input, shape index: {}]   ;;  %s3867_s2 = inlined_call_operand.vmem [shape: f32[1,512], index: 2, kind: input, shape index: {}]   ;;  %s3868_s3 = inlined_call_operand.hbm [shape: f32[8,24,128], index: 3, kind: output, shape index: {0}]   ;;  %s3869_s4 = inlined_call_operand.hbm [shape: f32[8,128], index: 4, kind: output, shape index: {1}]   ;;  %s3870_s5 = inlined_call_operand.hbm [shape: f32[8,128], index: 5, kind: output, shape index: {2}]  }
   0x1   :  { %13 = vsyncpa [#allocation5 + $0x1], 0 }
   0x2   :  { %14 = vsyncpa [#allocation8], 0 }
   0x3   :  { %15 = vsyncpa [#allocation6], 0 }
   0x4   :  { %17 = vsyncpa [#allocation6 + $0x1], 0 }
   0x5   :  { %18 = vsyncpa [#allocation11], 0  ;;  %s2914_s18 = smov 0   ;;  %s2916_s19 = smov 0  }
   0x6   :  { %s2918_s20 = smov 0   ;;  %s2920_s21 = smov 0  }
   0x7   :  { %s2922_s22 = smov 0   ;;  %s2924_s23 = smov 0  }
   0x8 LB: > { %s2238_s24 = sadd.s32 4294967295, %s2869_s23   ;;  %s2239_s25 = sadd.s32 4294967294, %s2869_s23   ;;  %s2869_s23 = sphi %s2924_s23, %s24_s23   ;;  %s2865_s22 = sphi %s2922_s22, %s3899_s22   ;;  %s2861_s21 = sphi %s2920_s21, %s3898_s21   ;;  %s2857_s20 = sphi %s2918_s20, %s3897_s20   ;;  %s2853_s19 = sphi %s2916_s19, %s3896_s19   ;;  %s2849_s18 = sphi %s2914_s18, %s3895_s18  }
   0x9   : > { %p58_p0 = scmp.ne.s32.totalorder %s2853_s19, %s2849_s18  ;;  %p2948_p1 = scmp.eq.s32.totalorder %s2238_s24, 0 }
   0xa   : > { %p2952_p2 = scmp.eq.s32.totalorder %s2238_s24, 2  ;;  %p132_p3 = scmp.eq.s32.totalorder %s2239_s25, 2 }
   0xb   : > { %s3878_s26 = scalar_select %p2948_p1, 1, 0 }
   0xc   : > { %s3879_s27 = scalar_select %p2952_p2, 1, 0 }
   0xd   : > { %p2958_p4 = por %p2948_p1, %p58_p0  ;;  %p2240_p5 = scmp.ge.s32.totalorder %s2869_s23, 1 }
   0xe   : > { %p2963_p6 = por %p132_p3, %p58_p0  ;;  %p191_p7 = scmp.lt.s32.totalorder %s2869_s23, 4 }
   0xf   : > { %s3880_s28 = scalar_select %p2958_p4, 1, 0 }
  0x10   : > { %s3881_s29 = scalar_select %p2963_p6, 1, 0 }
  0x11   : > { %p2968_p8 = pnand %p2240_p5, %p191_p7  ;;  %s2871_s6 = smov [#allocation7]  }
  0x12   : > { %s203_s7 = sshll.u32 %s2871_s6, 4  ;;  %s33_s9 = sadd.s32 1, %s2865_s22  ;;  %s204_s7 = int_to_ptr.vmem [resolvable:$true] %s203_s7 }
  0x13   : > { %s3882_s30 = scalar_select %p2968_p8, 1, 0 }
  0x14   : > { %p2382_p9 = pneg %p2968_p8  ;;  %s2669_s12 = scalar_lea.hbm %s3866_s1, 4096 }
  0x15   : > { %p2670_p11 = scmp.ne.s32.totalorder %s3866_s1, %s2669_s12  ;;  %p2676_p3 = scmp.lt.u32.totalorder %s2669_s12, %s3866_s1 }
  0x16   : > { %p2976_p10 = pnand %p2382_p9, %p2948_p1 }
  0x18   : > { %p2671_p12 = pneg %p2976_p10 }
  0x1a   : > { %p2672_p13 = pnand %p2671_p12, %p2670_p11 }
  0x1c   : > { %p2673_p0 = pneg %p2672_p13 }
  0x1e   : > { %p2678_p5 = pnand %p2676_p3, %p2673_p0 }
  0x20   : > { %2681 = shalt.err (!%p2678_p5)
}
  0x21   : > { %s2682_s17 = scalar_lea.vmem %s204_s7, 4096  ;;  %p2690_p1 = scmp.lt.s32.totalorder %s204_s7, %s204_s7 }
  0x22   : > { %p2683_p7 = scmp.ne.s32.totalorder %s204_s7, %s2682_s17  ;;  %p2691_p4 = scmp.lt.s32.totalorder %s2682_s17, %s2682_s17 }
  0x24   : > { %p2685_p9 = pnand %p2683_p7, %p2671_p12  ;;  %p2692_p8 = por %p2691_p4, %p2690_p1 }
  0x26   : > { %p2686_p6 = pneg %p2685_p9 }
  0x28   : > { %p2693_p2 = pnand %p2692_p8, %p2686_p6 }
  0x2a   : > { %2696 = shalt.err (!%p2693_p2)
}
  0x2b   : > { %s3876_s24 = smov 256   ;;  %s3877_s25 = smov 16  }
  0x2c   : > { %2385 = dma.hbm_to_vmem [thread:$0]  (!%p2976_p10), %s3866_s1, 4096, %s204_s7, [#allocation8], %s3876_s24, %s3876_s24, %s3877_s25  }
  0x2d   : > { %p34_p1 = scmp.ge.s32.totalorder %s33_s9, 3  ;;  %s45_s11 = sadd.s32 1, %s2857_s20 }
  0x2e   : > { %p52_p2 = scmp.ne.s32.totalorder %s2857_s20, %s2853_s19  ;;  %p53_p4 = scmp.eq.s32.totalorder %s2869_s23, 0 }
  0x2f   : > { %s3901_s9 = smov (%p34_p1, %s33_s9), 0  ;;  %p3885_p8 = scmp.ne.s32.totalorder %s3879_s27, 0 }
  0x30   : > { %p3006_p6 = por %p53_p4, %p52_p2  ;;  %s40_s13 = ssub.s32 %s2865_s22, %s3901_s9 }
  0x31   : > { %p3012_p11 = por %p3885_p8, %p52_p2  ;;  %p2395_p12 = scmp.lt.s32.totalorder %s2869_s23, 3 }
  0x32   : > { %p43_p10 = scmp.eq.s32.totalorder %s40_s13, 0  ;;  %s220_s7 = sand.u32 1, %s2857_s20  }
  0x33   : > { %s2243_s14 = sshll.u32 %s220_s7, 7  ;;  %s2365_s16 = sshll.u32 %s2865_s22, 11 }
  0x34   : > { %s3021_s15 = scalar_select %p43_p10, %s2857_s20, %s45_s11  }
  0x35   : > { %s3027_s10 = scalar_lea.hbm %s3865_s0, %s2365_s16  ;;  %s224_s24 = scalar_lea.vmem [#allocation4], %s2243_s14 }
  0x36   : > { %s234_s25 = sshll.u32 %s224_s24, 4  ;;  %p3033_p13 = pnand %p2395_p12, %p3006_p6  ;;  %s3029_s25 = int_to_ptr.vmem [resolvable:$true] %s234_s25 }
  0x37   : > { %s3037_s11 = scalar_lea.sflag [#allocation5], %s220_s7  ;;  %s2697_s17 = scalar_lea.hbm %s3027_s10, 2048 }
  0x38   : > { %p2698_p0 = scmp.ne.s32.totalorder %s3027_s10, %s2697_s17  ;;  %p2699_p3 = pneg %p3033_p13 }
  0x39   : > { %s2702_s12 = scalar_lea.hbm %s3865_s0, 6144  ;;  %p2703_p9 = scmp.lt.u32.totalorder %s3027_s10, %s3865_s0 }
  0x3a   : > { %p2700_p5 = pnand %p2699_p3, %p2698_p0  ;;  %p2704_p1 = scmp.lt.u32.totalorder %s2702_s12, %s2697_s17 }
  0x3b   : > { %p2706_p4 = scmp.lt.u32.totalorder %s2697_s17, %s3027_s10 }
  0x3c   : > { %p2701_p7 = pneg %p2700_p5  ;;  %p2705_p2 = por %p2704_p1, %p2703_p9 }
  0x3e   : > { %p2707_p6 = por %p2706_p4, %p2705_p2 }
  0x40   : > { %p2708_p8 = pnand %p2707_p6, %p2701_p7 }
  0x42   : > { %2711 = shalt.err (!%p2708_p8)
}
  0x43   : > { %s2712_s7 = scalar_lea.vmem %s3029_s25, 2048  ;;  %s2874_s24 = smov [#allocation4]  }
  0x44   : > { %p2713_p12 = scmp.ne.s32.totalorder %s3029_s25, %s2712_s7  ;;  %s2717_s14 = sshll.u32 %s2874_s24, 4  ;;  %s2718_s14 = int_to_ptr.vmem [resolvable:$false] %s2717_s14 }
  0x45   : > { %s2719_s16 = scalar_lea.vmem %s2718_s14, 4096  ;;  %p2720_p5 = scmp.lt.s32.totalorder %s3029_s25, %s2718_s14 }
  0x46   : > { %p2715_p10 = pnand %p2713_p12, %p2699_p3  ;;  %p2721_p9 = scmp.lt.s32.totalorder %s2719_s16, %s2712_s7 }
  0x48   : > { %p2716_p0 = pneg %p2715_p10  ;;  %p2722_p1 = por %p2721_p9, %p2720_p5 }
  0x4a   : > { %p2723_p2 = pnand %p2722_p1, %p2716_p0 }
  0x4c   : > { %2726 = shalt.err (!%p2723_p2)
}
  0x4d   : > { %s3888_s17 = smov 16   ;;  %s3889_s12 = smov 256  }
  0x4e   : > { %2389 = dma.hbm_to_vmem [thread:$0]  (!%p3033_p13), %s3027_s10, 2048, %s3029_s25, %s3037_s11, %s3889_s12, %s3889_s12, %s3888_s17  }
  0x4f   : > { %p3890_p3 = scmp.ne.s32.totalorder %s3882_s30, 0 }
  0x50   : > { %s3071_s6 = sand.u32 (!%p3890_p3), 1, %s2853_s19   ;;  %p3891_p7 = scmp.ne.s32.totalorder (!%p3890_p3), %s3880_s28, 0 }
  0x51   : > { %246 = sbr.rel (%p3890_p3) target bundleno = 2305 (0x901), region = 32  ;;  %s2248_s7 = sshll.u32 (!%p3890_p3), %s3071_s6, 7 }
  0x52   : > { %s249_s24 = scalar_lea.sflag (!%p3890_p3), [#allocation5], %s3071_s6  ;;  %s3075_s14 = scalar_lea.vmem (!%p3890_p3), [#allocation4], %s2248_s7 }
  0x58   : > { %2832 = dma.done.wait (%p3891_p7), %s249_s24, 2048  }
  0x59   : > { %2834 = vsyncadd (%p3891_p7), %s249_s24, 4294965248  ;;  %p3892_p13 = scmp.ne.s32.totalorder %s3878_s26, 0 }
  0x5b   : > { %2836 = dma.done.wait (%p3892_p13), [#allocation8], 4096  }
  0x5c   : > { %2838 = vsyncadd (%p3892_p13), [#allocation8], 4294963200  ;;  %s2250_s30 = sshll.u32 %s3071_s6, 6  ;;  %p2251_p4 = scmp.ne.s32.totalorder %s2861_s21, 0 }
  0x5d   : > { %s3086_s25 = scalar_lea.vmem [#allocation9], %s2250_s30  ;;  %v2875_v0 = vmov (!%p2251_p4), 0.0  }
  0x5e   : > { %289 = sbr.rel (%p2251_p4) target bundleno = 101 (0x65), region = 44  ;;  %290 = vst [vmem:[#allocation2] sm:$0xff] (!%p2251_p4), %v2875_v0  ;;  %291 = vst [vmem:[#allocation3] sm:$0xff] (!%p2251_p4), %v2875_v0 }
  0x65 PF: > { %v3089_v1 = vld [vmem:[#allocation7 + $0x4] ss:$16 sps:$4 sm:$0xff]   ;;  %v3091_v2 = vld [vmem:[#allocation7] ss:$16 sps:$4 sm:$0xff]   ;;  %v2876_v3 = vmov 0   ;;  %v334_v36 = vlaneseq  ;;  %v328_v47 = vld [vmem:[%s3075_s14 + $0x8] sm:$0xff] }
  0x66   : > { %551 = vmatprep.mubr.bf16.mxu0 %v2876_v3  ;;  %592 = vmatprep.mubr.bf16.mxu1 %v2876_v3  ;;  %v3096_v4 = vld [vmem:[#allocation7 + $0x24] ss:$16 sps:$4 sm:$0xff]   ;;  %v3099_v5 = vld [vmem:[#allocation7 + $0x20] ss:$16 sps:$4 sm:$0xff]   ;;  %v3104_v7 = vld [vmem:[#allocation7 + $0xc] ss:$16 sps:$4 sm:$0xff]   ;;  %v332_v50 = vunpack.c.h.bf16 %v328_v47  ;;  %v331_v62 = vunpack.c.l.bf16 %v328_v47 }
  0x67   : > { %519 = vmatprep.subr.bf16.mxu0 %v3089_v1  ;;  %v3102_v6 = vld [vmem:[#allocation7 + $0x44] ss:$16 sps:$4 sm:$0xff]   ;;  %v3106_v8 = vld [vmem:[#allocation7 + $0x8] ss:$16 sps:$4 sm:$0xff]   ;;  %v3109_v9 = vld [vmem:[#allocation7 + $0x40] ss:$16 sps:$4 sm:$0xff]   ;;  %560 = vmatprep.subr.bf16.mxu1 %v3104_v7 }
  0x68   : > { %520 = vmatpush1.bf16.msra.mxu0 %v3091_v2  ;;  %v3113_v10 = vld [vmem:[#allocation7 + $0x64] ss:$16 sps:$4 sm:$0xff]   ;;  %561 = vmatpush1.bf16.msra.mxu1 %v3106_v8  ;;  %v3116_v11 = vld [vmem:[#allocation7 + $0x2c] ss:$16 sps:$4 sm:$0xff]   ;;  %v3118_v12 = vld [vmem:[#allocation7 + $0x28] ss:$16 sps:$4 sm:$0xff]  }
  0x69   : > { %521 = vmatprep.subr.bf16.mxu0 %v3096_v4  ;;  %562 = vmatprep.subr.bf16.mxu1 %v3116_v11  ;;  %v3122_v13 = vld [vmem:[#allocation7 + $0x60] ss:$16 sps:$4 sm:$0xff]   ;;  %v3124_v14 = vld [vmem:[#allocation7 + $0x84] ss:$16 sps:$4 sm:$0xff]   ;;  %v3126_v15 = vld [vmem:[#allocation7 + $0x4c] ss:$16 sps:$4 sm:$0xff]  }
  0x6a   : > { %v3130_v16 = vld [vmem:[#allocation7 + $0x48] ss:$16 sps:$4 sm:$0xff]   ;;  %v3133_v17 = vld [vmem:[#allocation7 + $0x6c] ss:$16 sps:$4 sm:$0xff]   ;;  %v3136_v18 = vld [vmem:[#allocation7 + $0x80] ss:$16 sps:$4 sm:$0xff]  }
  0x6b   : > { %v3139_v19 = vld [vmem:[#allocation7 + $0xa4] ss:$16 sps:$4 sm:$0xff]   ;;  %v3142_v20 = vld [vmem:[#allocation7 + $0x68] ss:$16 sps:$4 sm:$0xff]   ;;  %v3145_v21 = vld [vmem:[#allocation7 + $0x8c] ss:$16 sps:$4 sm:$0xff]  }
  0x6c   : > { %522 = vmatpush1.bf16.msra.mxu0 %v3099_v5  ;;  %563 = vmatpush1.bf16.msra.mxu1 %v3118_v12  ;;  %v3147_v22 = vld [vmem:[#allocation7 + $0xa0] ss:$16 sps:$4 sm:$0xff]   ;;  %v3150_v23 = vld [vmem:[#allocation7 + $0xc4] ss:$16 sps:$4 sm:$0xff]   ;;  %v3154_v24 = vld [vmem:[#allocation7 + $0x88] ss:$16 sps:$4 sm:$0xff]  }
  0x6d   : > { %523 = vmatprep.subr.bf16.mxu0 %v3102_v6  ;;  %564 = vmatprep.subr.bf16.mxu1 %v3126_v15  ;;  %v3157_v25 = vld [vmem:[#allocation7 + $0xac] ss:$16 sps:$4 sm:$0xff]   ;;  %v3160_v26 = vld [vmem:[#allocation7 + $0xc0] ss:$16 sps:$4 sm:$0xff]   ;;  %v3163_v27 = vld [vmem:[#allocation7 + $0xe4] ss:$16 sps:$4 sm:$0xff]  }
  0x6e   : > { %v3166_v28 = vld [vmem:[#allocation7 + $0xa8] ss:$16 sps:$4 sm:$0xff]   ;;  %v3169_v29 = vld [vmem:[#allocation7 + $0xcc] ss:$16 sps:$4 sm:$0xff]   ;;  %v3172_v30 = vld [vmem:[#allocation7 + $0xe0] ss:$16 sps:$4 sm:$0xff]  }
  0x6f   : > { %v3174_v31 = vld [vmem:[#allocation2] sm:$0xff]  ;;  %v3178_v32 = vld [vmem:[#allocation7 + $0xc8] ss:$16 sps:$4 sm:$0xff]   ;;  %v3181_v33 = vld [vmem:[#allocation7 + $0xec] ss:$16 sps:$4 sm:$0xff]   ;;  %v3227_v37 = vshrl.u32 %v334_v36, 7 }
  0x70   : > { %524 = vmatpush1.bf16.msra.mxu0 %v3109_v9  ;;  %565 = vmatpush1.bf16.msra.mxu1 %v3130_v16  ;;  %v358_v34 = vpack.c.bf16 %v3174_v31, %v3174_v31  ;;  %v3187_v35 = vld [vmem:[#allocation7 + $0xe8] ss:$16 sps:$4 sm:$0xff]   ;;  %v326_v39 = vld [vmem:[%s3867_s2] sm:$0xf]  ;;  %v327_v40 = vld [vmem:[%s3075_s14] sm:$0xff]  ;;  %s3251_s10 = sshll.u32 %s2861_s21, 3 }
  0x71   : > { %525 = vmatprep.subr.bf16.mxu0 %v3113_v10  ;;  %566 = vmatprep.subr.bf16.mxu1 %v3133_v17  ;;  %v336_v38 = vsub.s32 0, %v3227_v37  ;;  %v340_v41 = vsub.s32 1, %v3227_v37  ;;  %v329_v42 = vunpack.c.l.bf16 %v327_v40  ;;  %v330_v44 = vunpack.c.h.bf16 %v327_v40  ;;  %p630_p6 = scmp.lt.s32.totalorder %s3251_s10, 20  ;;  %s824_s11 = sadd.s32 1, %s3251_s10 }
  0x72   : > { %v348_v46 = vsub.s32 3, %v3227_v37  ;;  %v344_v53 = vsub.s32 2, %v3227_v37  ;;  %p825_p8 = scmp.lt.s32.totalorder %s824_s11, 20  ;;  %s1019_s17 = sadd.s32 2, %s3251_s10 }
  0x73   : > { %v3235_v43 = vrot.slane %v326_v39, %v336_v38  ;;  %v3237_v45 = vrot.slane %v326_v39, %v340_v41  ;;  %s631_s13 = scalar_select %p630_p6, 1, 0 }
  0x74   : > { %526 = vmatpush1.bf16.msra.mxu0 %v3122_v13  ;;  %567 = vmatpush1.bf16.msra.mxu1 %v3142_v20  ;;  %v3243_v51 = vrot.slane %v326_v39, %v348_v46  ;;  %v3247_v63 = vrot.slane %v326_v39, %v344_v53  ;;  %s826_s16 = scalar_select %p825_p8, 1, 0 }
  0x75   : > { %527 = vmatprep.subr.bf16.mxu0 %v3124_v14  ;;  %568 = vmatprep.subr.bf16.mxu1 %v3145_v21  ;;  %v354_v48 = vadd.f32 %v3235_v43, %v329_v42  ;;  %v355_v49 = vadd.f32 %v3237_v45, %v330_v44  ;;  %p1020_p12 = scmp.lt.s32.totalorder %s1019_s17, 20  ;;  %s1214_s7 = sadd.s32 3, %s3251_s10 }
  0x76   : > { %v357_v60 = vadd.f32 %v3243_v51, %v332_v50  ;;  %v356_v40 = vadd.f32 %v3247_v63, %v331_v62  ;;  %p1215_p10 = scmp.lt.s32.totalorder %s1214_s7, 20  ;;  %s1409_s30 = sadd.s32 4, %s3251_s10 }
  0x77   : > { %s1021_s12 = scalar_select %p1020_p12, 1, 0 }
  0x78   : > { %528 = vmatpush1.bf16.msra.mxu0 %v3136_v18  ;;  %569 = vmatpush1.bf16.msra.mxu1 %v3154_v24  ;;  %s1216_s24 = scalar_select %p1215_p10, 1, 0 }
  0x79   : > { %529 = vmatprep.subr.bf16.mxu0 %v3139_v19  ;;  %570 = vmatprep.subr.bf16.mxu1 %v3157_v25  ;;  %p1410_p0 = scmp.lt.s32.totalorder %s1409_s30, 20  ;;  %s1604_s28 = sadd.s32 5, %s3251_s10 }
  0x7a   : > { %p1605_p5 = scmp.lt.s32.totalorder %s1604_s28, 20  ;;  %s1799_s11 = sadd.s32 6, %s3251_s10 }
  0x7b   : > { %s1411_s26 = scalar_select %p1410_p0, 1, 0 }
  0x7c   : > { %530 = vmatpush1.bf16.msra.mxu0 %v3147_v22  ;;  %571 = vmatpush1.bf16.msra.mxu1 %v3166_v28  ;;  %p1800_p9 = scmp.lt.s32.totalorder %s1799_s11, 20  ;;  %p2355_p2 = scmp.ne.s32.totalorder %s2861_s21, 2 }
  0x7d   : > { %531 = vmatprep.subr.bf16.mxu0 %v3150_v23  ;;  %572 = vmatprep.subr.bf16.mxu1 %v3169_v29 }
  0x80   : > { %532 = vmatpush1.bf16.msra.mxu0 %v3160_v26  ;;  %573 = vmatpush1.bf16.msra.mxu1 %v3178_v32 }
  0x81   : > { %533 = vmatprep.subr.bf16.mxu0 %v3163_v27  ;;  %574 = vmatprep.subr.bf16.mxu1 %v3181_v33 }
  0x84   : > { %534 = vmatpush1.bf16.msra.mxu0 %v3172_v30  ;;  %575 = vmatpush1.bf16.msra.mxu1 %v3187_v35 }
  0x85   : > { %714 = vmatprep.subr.bf16.mxu0 %v3089_v1  ;;  %755 = vmatprep.subr.bf16.mxu1 %v3104_v7 }
  0x87   : > { %552 = vmatmul.mubr.bf16.vlgmr.msra.gmra.mrb[0].mxu0 %v358_v34  ;;  %593 = vmatmul.mubr.bf16.vlgmr.msra.gmra.mrb[0].mxu1 %v358_v34 }
  0x88   : > { %715 = vmatpush1.bf16.msra.mxu0 %v3091_v2  ;;  %746 = vmatprep.mubr.bf16.mxu0 %v2876_v3 }
  0x89   : > { %716 = vmatprep.subr.bf16.mxu0 %v3096_v4  ;;  %756 = vmatpush1.bf16.msra.mxu1 %v3106_v8 }
  0x8a   : > { %757 = vmatprep.subr.bf16.mxu1 %v3116_v11  ;;  %787 = vmatprep.mubr.bf16.mxu1 %v2876_v3 }
  0x8c   : > { %717 = vmatpush1.bf16.msra.mxu0 %v3099_v5 }
  0x8d   : > { %718 = vmatprep.subr.bf16.mxu0 %v3102_v6  ;;  %758 = vmatpush1.bf16.msra.mxu1 %v3118_v12 }
  0x8e   : > { %759 = vmatprep.subr.bf16.mxu1 %v3126_v15 }
  0x90   : > { %719 = vmatpush1.bf16.msra.mxu0 %v3109_v9 }
  0x91   : > { %720 = vmatprep.subr.bf16.mxu0 %v3113_v10  ;;  %760 = vmatpush1.bf16.msra.mxu1 %v3130_v16 }
  0x92   : > { %761 = vmatprep.subr.bf16.mxu1 %v3133_v17 }
  0x94   : > { %721 = vmatpush1.bf16.msra.mxu0 %v3122_v13 }
  0x95   : > { %722 = vmatprep.subr.bf16.mxu0 %v3124_v14  ;;  %762 = vmatpush1.bf16.msra.mxu1 %v3142_v20 }
  0x96   : > { %763 = vmatprep.subr.bf16.mxu1 %v3145_v21 }
  0x98   : > { %723 = vmatpush1.bf16.msra.mxu0 %v3136_v18 }
  0x99   : > { %724 = vmatprep.subr.bf16.mxu0 %v3139_v19  ;;  %764 = vmatpush1.bf16.msra.mxu1 %v3154_v24 }
  0x9a   : > { %765 = vmatprep.subr.bf16.mxu1 %v3157_v25 }
  0x9c   : > { %725 = vmatpush1.bf16.msra.mxu0 %v3147_v22 }
  0x9d   : > { %726 = vmatprep.subr.bf16.mxu0 %v3150_v23  ;;  %766 = vmatpush1.bf16.msra.mxu1 %v3166_v28 }
  0x9e   : > { %767 = vmatprep.subr.bf16.mxu1 %v3169_v29 }
  0xa0   : > { %727 = vmatpush1.bf16.msra.mxu0 %v3160_v26 }
  0xa1   : > { %728 = vmatprep.subr.bf16.mxu0 %v3163_v27  ;;  %768 = vmatpush1.bf16.msra.mxu1 %v3178_v32 }
  0xa2   : > { %769 = vmatprep.subr.bf16.mxu1 %v3181_v33 }
  0xa4   : > { %729 = vmatpush1.bf16.msra.mxu0 %v3172_v30 }
  0xa5   : > { %909 = vmatprep.subr.bf16.mxu0 %v3089_v1  ;;  %770 = vmatpush1.bf16.msra.mxu1 %v3187_v35 }
  0xa6   : > { %950 = vmatprep.subr.bf16.mxu1 %v3104_v7 }
 0x15a   : > { %v553_v52 = vpop.f32.mrb[0].mxu0  ;;  %v594_v0 = vpop.f32.mrb[0].mxu1 }
 0x15b   : > { %v601_v54 = vadd.f32 %v553_v52, %v354_v48  ;;  %v555_v55 = vpop.f32.mrb[1].mxu0  ;;  %v596_v34 = vpop.f32.mrb[1].mxu1  ;;  %v603_v44 = vadd.f32 %v594_v0, %v356_v40  ;;  %v293_v52 = vld [vmem:[#allocation3] sm:$0xff] }
 0x15c   : > { %v602_v56 = vadd.f32 %v555_v55, %v355_v49  ;;  %v557_v57 = vpop.f32.mrb[2].mxu0  ;;  %v604_v36 = vadd.f32 %v596_v34, %v357_v60  ;;  %v598_v38 = vpop.f32.mrb[2].mxu1  ;;  %v632_v55 = vstv %s631_s13  ;;  %s1606_s13 = scalar_select %p1605_p5, 1, 0 }
 0x15d   : > { %v2284_v58 = vmul.f32 -1.442695, %v601_v54  ;;  %v558_v59 = vpop.f32.mrb[3].mxu0  ;;  %v599_v41 = vpop.f32.mrb[3].mxu1  ;;  %vm633_vm0 = vcmp.eq.s32.totalorder %v632_v55, 1 }
 0x15e   : > { %v2285_v61 = vmul.f32 -1.442695, %v602_v56  ;;  %v2286_v42 = vmul.f32 -1.442695, %v604_v36 }
 0x15f   : > { %2509 = vpow2.f32 %v2284_v58 }
 0x160   : > { %2511 = vpow2.f32 %v2285_v61  ;;  %v2877_v61 = vmov 1966171168  }
 0x161   : > { %2513 = vpow2.f32 %v2286_v42  ;;  %v639_v62 = vunpack.c.l.s4 %v2877_v61  ;;  %v2293_v61 = vld [vmem:[%s3075_s14 + $0x18] sm:$0xff] }
 0x162   : > { %2515 = vtanh.f32 %v603_v44 }
 0x163   : > { %v640_v0 = vunpack.c.0.s8 %v639_v62 }
 0x165   : > { %v3257_v38 = vsub.s32 %v640_v0, %v3227_v37 }
 0x169   : > { %v2510_v46 = vpop.eup %2509 }
 0x16a   : > { %v2512_v48 = vpop.eup %2511  ;;  %v608_v49 = vadd.f32 1.0, %v2510_v46 }
 0x16b   : > { %v614_v47 = vadd.f32 1.0, %v2512_v48  ;;  %v2514_v39 = vpop.eup %2513 }
 0x16c   : > { %2517 = vrcp.f32 %v608_v49  ;;  %v2516_v50 = vpop.eup %2515  ;;  %v621_v54 = vadd.f32 1.0, %v2514_v39 }
 0x16d   : > { %2519 = vrcp.f32 %v614_v47 }
 0x16e   : > { %2521 = vrcp.f32 %v621_v54 }
 0x176   : > { %v2518_v53 = vpop.eup %2517 }
 0x177   : > { %v2520_v56 = vpop.eup %2519  ;;  %v625_v57 = vmul.f32 %v2518_v53, %v2516_v50 }
 0x178   : > { %v624_v58 = vmul.f32 %v2520_v56, %v293_v52  ;;  %v2522_v34 = vpop.eup %2521  ;;  %v2292_v56 = vld [vmem:[%s3075_s14 + $0x10] sm:$0xff] }
 0x17a   : > { %v626_v59 = vadd.f32 %v625_v57, %v624_v58  ;;  %v705_v57 = vunpack.c.l.bf16 %v2292_v56  ;;  %v706_v58 = vunpack.c.h.bf16 %v2292_v56 }
 0x17c   : > { %2523 = vtanh.f32 %v626_v59  ;;  %v3254_v60 = vsel %vm633_vm0, %v626_v59, %v293_v52  ;;  %v709_v59 = vadd.f32 %v705_v57, %v3235_v43  ;;  %v710_v62 = vadd.f32 %v706_v58, %v3237_v45 }
 0x186   : > { %v2524_v36 = vpop.eup %2523 }
 0x187   : > { %v628_v40 = vmul.f32 %v2524_v36, %v2522_v34  ;;  %v708_v36 = vunpack.c.h.bf16 %v2293_v61 }
 0x189   : > { %v3260_v41 = vsel %vm633_vm0, %v628_v40, %v3174_v31 }
 0x18a   : > { %v637_v42 = vcombine.high %v3260_v41, %v3260_v41  ;;  %v644_v44 = vrot.slane %v3260_v41, %v3257_v38  ;;  %v713_v46 = vpack.c.bf16 %v3260_v41, %v3260_v41 }
 0x18c   : > { %v651_v48 = vrot.slane %v637_v42, %v3257_v38  ;;  %v652_v49 = vcombine.high %v644_v44, %v644_v44  ;;  %v660_v37 = vrot.slane %v644_v44, %v3257_v38  ;;  %2288 = vst.sshfl [vmem:[%s3086_s25] sm:$0x1 pattern:$0x73625140] %v644_v44  ;;  %747 = vmatmul.mubr.bf16.vlgmr.msra.gmra.mrb[4].mxu0 %v713_v46 }
 0x18d   : > { %788 = vmatmul.mubr.bf16.vlgmr.msra.gmra.mrb[4].mxu1 %v713_v46  ;;  %910 = vmatpush1.bf16.msra.mxu0 %v3091_v2 }
 0x18e   : > { %951 = vmatpush1.bf16.msra.mxu1 %v3106_v8  ;;  %v653_v31 = vcombine.high %v651_v48, %v651_v48  ;;  %v667_v47 = vrot.slane %v651_v48, %v3257_v38  ;;  %v674_v39 = vrot.slane %v652_v49, %v3257_v38  ;;  %v682_v50 = vcombine.high %v660_v37, %v660_v37 }
 0x18f   : > { %2289 = vst.sshfl [vmem:[%s3086_s25 + $0x8] sm:$0x1 pattern:$0x73625140] %v652_v49  ;;  %911 = vmatprep.subr.bf16.mxu0 %v3096_v4  ;;  %952 = vmatprep.subr.bf16.mxu1 %v3116_v11 }
 0x190   : > { %2290 = vst.sshfl [vmem:[%s3086_s25 + $0x20] sm:$0x1 pattern:$0x73625140] %v651_v48  ;;  %941 = vmatprep.mubr.bf16.mxu0 %v2876_v3  ;;  %v681_v52 = vrot.slane %v653_v31, %v3257_v38  ;;  %v683_v53 = vcombine.high %v667_v47, %v667_v47  ;;  %v684_v54 = vcombine.high %v674_v39, %v674_v39  ;;  %696 = vst [vmem:[%s3086_s25 + $0x10] sm:$0x1] %v682_v50 }
 0x191   : > { %2291 = vst.sshfl [vmem:[%s3086_s25 + $0x28] sm:$0x1 pattern:$0x73625140] %v653_v31  ;;  %982 = vmatprep.mubr.bf16.mxu1 %v2876_v3  ;;  %912 = vmatpush1.bf16.msra.mxu0 %v3099_v5  ;;  %v712_v50 = vadd.f32 %v708_v36, %v3243_v51 }
 0x192   : > { %953 = vmatpush1.bf16.msra.mxu1 %v3118_v12  ;;  %v685_v55 = vcombine.high %v681_v52, %v681_v52  ;;  %697 = vst [vmem:[%s3086_s25 + $0x18] sm:$0x1] %v684_v54  ;;  %700 = vst [vmem:[%s3086_s25 + $0x30] sm:$0x1] %v683_v53  ;;  %913 = vmatprep.subr.bf16.mxu0 %v3102_v6  ;;  %v707_v52 = vunpack.c.l.bf16 %v2293_v61 }
 0x193   : > { %954 = vmatprep.subr.bf16.mxu1 %v3126_v15 }
 0x194   : > { %701 = vst [vmem:[%s3086_s25 + $0x38] sm:$0x1] %v685_v55  ;;  %v711_v54 = vadd.f32 %v707_v52, %v3247_v63 }
 0x195   : > { %914 = vmatpush1.bf16.msra.mxu0 %v3109_v9 }
 0x196   : > { %955 = vmatpush1.bf16.msra.mxu1 %v3130_v16  ;;  %915 = vmatprep.subr.bf16.mxu0 %v3113_v10 }
 0x197   : > { %956 = vmatprep.subr.bf16.mxu1 %v3133_v17 }
 0x199   : > { %916 = vmatpush1.bf16.msra.mxu0 %v3122_v13 }
 0x19a   : > { %957 = vmatpush1.bf16.msra.mxu1 %v3142_v20  ;;  %917 = vmatprep.subr.bf16.mxu0 %v3124_v14 }
 0x19b   : > { %958 = vmatprep.subr.bf16.mxu1 %v3145_v21 }
 0x19d   : > { %918 = vmatpush1.bf16.msra.mxu0 %v3136_v18 }
 0x19e   : > { %959 = vmatpush1.bf16.msra.mxu1 %v3154_v24  ;;  %919 = vmatprep.subr.bf16.mxu0 %v3139_v19 }
 0x19f   : > { %960 = vmatprep.subr.bf16.mxu1 %v3157_v25 }
 0x1a1   : > { %920 = vmatpush1.bf16.msra.mxu0 %v3147_v22 }
 0x1a2   : > { %961 = vmatpush1.bf16.msra.mxu1 %v3166_v28  ;;  %921 = vmatprep.subr.bf16.mxu0 %v3150_v23 }
 0x1a3   : > { %962 = vmatprep.subr.bf16.mxu1 %v3169_v29 }
 0x1a5   : > { %922 = vmatpush1.bf16.msra.mxu0 %v3160_v26 }
 0x1a6   : > { %963 = vmatpush1.bf16.msra.mxu1 %v3178_v32  ;;  %923 = vmatprep.subr.bf16.mxu0 %v3163_v27 }
 0x1a7   : > { %964 = vmatprep.subr.bf16.mxu1 %v3181_v33 }
 0x1a9   : > { %924 = vmatpush1.bf16.msra.mxu0 %v3172_v30 }
 0x1aa   : > { %965 = vmatpush1.bf16.msra.mxu1 %v3187_v35  ;;  %1104 = vmatprep.subr.bf16.mxu0 %v3089_v1 }
 0x1ab   : > { %1145 = vmatprep.subr.bf16.mxu1 %v3104_v7 }
 0x25f   : > { %v748_v0 = vpop.f32.mrb[4].mxu0 }
 0x260   : > { %v789_v34 = vpop.f32.mrb[4].mxu1  ;;  %v796_v40 = vadd.f32 %v748_v0, %v709_v59  ;;  %v750_v42 = vpop.f32.mrb[5].mxu0 }
 0x261   : > { %v791_v44 = vpop.f32.mrb[5].mxu1  ;;  %v797_v46 = vadd.f32 %v750_v42, %v710_v62  ;;  %v752_v48 = vpop.f32.mrb[6].mxu0  ;;  %v798_v56 = vadd.f32 %v789_v34, %v711_v54 }
 0x262   : > { %v793_v49 = vpop.f32.mrb[6].mxu1  ;;  %v2294_v37 = vmul.f32 -1.442695, %v796_v40  ;;  %v753_v31 = vpop.f32.mrb[7].mxu0  ;;  %v799_v53 = vadd.f32 %v791_v44, %v712_v50  ;;  %v827_v40 = vstv %s826_s16  ;;  %s1801_s16 = scalar_select %p1800_p9, 1, 0 }
 0x263   : > { %v794_v47 = vpop.f32.mrb[7].mxu1  ;;  %v2295_v39 = vmul.f32 -1.442695, %v797_v46  ;;  %vm828_vm1 = vcmp.eq.s32.totalorder %v827_v40, 1 }
 0x264   : > { %2525 = vpow2.f32 %v2294_v37  ;;  %v2296_v55 = vmul.f32 -1.442695, %v799_v53 }
 0x265   : > { %2527 = vpow2.f32 %v2295_v39 }
 0x266   : > { %2529 = vpow2.f32 %v2296_v55 }
 0x267   : > { %2531 = vtanh.f32 %v798_v56 }
 0x26e   : > { %v2526_v57 = vpop.eup %2525 }
 0x26f   : > { %v2528_v58 = vpop.eup %2527  ;;  %v803_v59 = vadd.f32 1.0, %v2526_v57 }
 0x270   : > { %v809_v62 = vadd.f32 1.0, %v2528_v58  ;;  %v2530_v0 = vpop.eup %2529 }
 0x271   : > { %2533 = vrcp.f32 %v803_v59  ;;  %v2532_v36 = vpop.eup %2531  ;;  %v816_v46 = vadd.f32 1.0, %v2530_v0 }
 0x272   : > { %2535 = vrcp.f32 %v809_v62 }
 0x273   : > { %2537 = vrcp.f32 %v816_v46  ;;  %v2302_v46 = vld [vmem:[%s3075_s14 + $0x28] sm:$0xff] }
 0x27b   : > { %v2534_v61 = vpop.eup %2533 }
 0x27c   : > { %v2536_v42 = vpop.eup %2535  ;;  %v820_v44 = vmul.f32 %v2534_v61, %v2532_v36  ;;  %v2301_v61 = vld [vmem:[%s3075_s14 + $0x20] sm:$0xff] }
 0x27d   : > { %v819_v34 = vmul.f32 %v2536_v42, %v3254_v60  ;;  %v2538_v37 = vpop.eup %2537  ;;  %v900_v40 = vunpack.c.l.bf16 %v2301_v61  ;;  %v901_v42 = vunpack.c.h.bf16 %v2301_v61 }
 0x27f   : > { %v821_v48 = vadd.f32 %v820_v44, %v819_v34  ;;  %v904_v44 = vadd.f32 %v900_v40, %v3235_v43  ;;  %v905_v34 = vadd.f32 %v901_v42, %v3237_v45 }
 0x281   : > { %2539 = vtanh.f32 %v821_v48  ;;  %v3324_v49 = vsel %vm828_vm1, %v821_v48, %v3254_v60 }
 0x28b   : > { %v2540_v31 = vpop.eup %2539 }
 0x28c   : > { %v823_v47 = vmul.f32 %v2540_v31, %v2538_v37  ;;  %v903_v31 = vunpack.c.h.bf16 %v2302_v46 }
 0x28e   : > { %v3327_v39 = vsel %vm828_vm1, %v823_v47, %v3260_v41 }
 0x28f   : > { %v832_v50 = vcombine.high %v3327_v39, %v3327_v39  ;;  %v839_v52 = vrot.slane %v3327_v39, %v3257_v38  ;;  %v908_v53 = vpack.c.bf16 %v3327_v39, %v3327_v39 }
 0x291   : > { %v846_v60 = vrot.slane %v832_v50, %v3257_v38  ;;  %v847_v54 = vcombine.high %v839_v52, %v839_v52  ;;  %v855_v55 = vrot.slane %v839_v52, %v3257_v38  ;;  %2297 = vst.sshfl [vmem:[%s3086_s25 + $0x1] sm:$0x1 pattern:$0x73625140] %v839_v52  ;;  %942 = vmatmul.mubr.bf16.vlgmr.msra.gmra.mrb[8].mxu0 %v908_v53 }
 0x292   : > { %983 = vmatmul.mubr.bf16.vlgmr.msra.gmra.mrb[8].mxu1 %v908_v53  ;;  %1105 = vmatpush1.bf16.msra.mxu0 %v3091_v2 }
 0x293   : > { %1146 = vmatpush1.bf16.msra.mxu1 %v3106_v8  ;;  %v848_v41 = vcombine.high %v846_v60, %v846_v60  ;;  %v862_v56 = vrot.slane %v846_v60, %v3257_v38  ;;  %v869_v57 = vrot.slane %v847_v54, %v3257_v38  ;;  %v877_v58 = vcombine.high %v855_v55, %v855_v55 }
 0x294   : > { %2298 = vst.sshfl [vmem:[%s3086_s25 + $0x9] sm:$0x1 pattern:$0x73625140] %v847_v54  ;;  %1106 = vmatprep.subr.bf16.mxu0 %v3096_v4  ;;  %1147 = vmatprep.subr.bf16.mxu1 %v3116_v11 }
 0x295   : > { %2299 = vst.sshfl [vmem:[%s3086_s25 + $0x21] sm:$0x1 pattern:$0x73625140] %v846_v60  ;;  %1136 = vmatprep.mubr.bf16.mxu0 %v2876_v3  ;;  %v876_v59 = vrot.slane %v848_v41, %v3257_v38  ;;  %v878_v62 = vcombine.high %v862_v56, %v862_v56  ;;  %v879_v0 = vcombine.high %v869_v57, %v869_v57  ;;  %891 = vst [vmem:[%s3086_s25 + $0x11] sm:$0x1] %v877_v58 }
 0x296   : > { %2300 = vst.sshfl [vmem:[%s3086_s25 + $0x29] sm:$0x1 pattern:$0x73625140] %v848_v41  ;;  %1177 = vmatprep.mubr.bf16.mxu1 %v2876_v3  ;;  %1107 = vmatpush1.bf16.msra.mxu0 %v3099_v5  ;;  %v907_v58 = vadd.f32 %v903_v31, %v3243_v51 }
 0x297   : > { %1148 = vmatpush1.bf16.msra.mxu1 %v3118_v12  ;;  %v880_v36 = vcombine.high %v876_v59, %v876_v59  ;;  %892 = vst [vmem:[%s3086_s25 + $0x19] sm:$0x1] %v879_v0  ;;  %895 = vst [vmem:[%s3086_s25 + $0x31] sm:$0x1] %v878_v62  ;;  %1108 = vmatprep.subr.bf16.mxu0 %v3102_v6  ;;  %v902_v59 = vunpack.c.l.bf16 %v2302_v46 }
 0x298   : > { %1149 = vmatprep.subr.bf16.mxu1 %v3126_v15 }
 0x299   : > { %896 = vst [vmem:[%s3086_s25 + $0x39] sm:$0x1] %v880_v36  ;;  %v906_v0 = vadd.f32 %v902_v59, %v3247_v63 }
 0x29a   : > { %1109 = vmatpush1.bf16.msra.mxu0 %v3109_v9 }
 0x29b   : > { %1150 = vmatpush1.bf16.msra.mxu1 %v3130_v16  ;;  %1110 = vmatprep.subr.bf16.mxu0 %v3113_v10 }
 0x29c   : > { %1151 = vmatprep.subr.bf16.mxu1 %v3133_v17 }
 0x29e   : > { %1111 = vmatpush1.bf16.msra.mxu0 %v3122_v13 }
 0x29f   : > { %1152 = vmatpush1.bf16.msra.mxu1 %v3142_v20  ;;  %1112 = vmatprep.subr.bf16.mxu0 %v3124_v14 }
 0x2a0   : > { %1153 = vmatprep.subr.bf16.mxu1 %v3145_v21 }
 0x2a2   : > { %1113 = vmatpush1.bf16.msra.mxu0 %v3136_v18 }
 0x2a3   : > { %1154 = vmatpush1.bf16.msra.mxu1 %v3154_v24  ;;  %1114 = vmatprep.subr.bf16.mxu0 %v3139_v19 }
 0x2a4   : > { %1155 = vmatprep.subr.bf16.mxu1 %v3157_v25 }
 0x2a6   : > { %1115 = vmatpush1.bf16.msra.mxu0 %v3147_v22 }
 0x2a7   : > { %1156 = vmatpush1.bf16.msra.mxu1 %v3166_v28  ;;  %1116 = vmatprep.subr.bf16.mxu0 %v3150_v23 }
 0x2a8   : > { %1157 = vmatprep.subr.bf16.mxu1 %v3169_v29 }
 0x2aa   : > { %1117 = vmatpush1.bf16.msra.mxu0 %v3160_v26 }
 0x2ab   : > { %1158 = vmatpush1.bf16.msra.mxu1 %v3178_v32  ;;  %1118 = vmatprep.subr.bf16.mxu0 %v3163_v27 }
 0x2ac   : > { %1159 = vmatprep.subr.bf16.mxu1 %v3181_v33 }
 0x2ae   : > { %1119 = vmatpush1.bf16.msra.mxu0 %v3172_v30 }
 0x2af   : > { %1160 = vmatpush1.bf16.msra.mxu1 %v3187_v35  ;;  %1299 = vmatprep.subr.bf16.mxu0 %v3089_v1 }
 0x2b0   : > { %1340 = vmatprep.subr.bf16.mxu1 %v3104_v7 }
 0x364   : > { %v943_v48 = vpop.f32.mrb[8].mxu0 }
 0x365   : > { %v984_v37 = vpop.f32.mrb[8].mxu1  ;;  %v991_v47 = vadd.f32 %v943_v48, %v904_v44  ;;  %v945_v50 = vpop.f32.mrb[9].mxu0 }
 0x366   : > { %v986_v52 = vpop.f32.mrb[9].mxu1  ;;  %v992_v53 = vadd.f32 %v945_v50, %v905_v34  ;;  %v947_v60 = vpop.f32.mrb[10].mxu0  ;;  %v993_v61 = vadd.f32 %v984_v37, %v906_v0 }
 0x367   : > { %v988_v54 = vpop.f32.mrb[10].mxu1  ;;  %v2303_v55 = vmul.f32 -1.442695, %v991_v47  ;;  %v948_v41 = vpop.f32.mrb[11].mxu0  ;;  %v994_v62 = vadd.f32 %v986_v52, %v907_v58  ;;  %v1022_v47 = vstv %s1021_s12 }
 0x368   : > { %v989_v56 = vpop.f32.mrb[11].mxu1  ;;  %v2304_v57 = vmul.f32 -1.442695, %v992_v53  ;;  %vm1023_vm2 = vcmp.eq.s32.totalorder %v1022_v47, 1 }
 0x369   : > { %2541 = vpow2.f32 %v2303_v55  ;;  %v2305_v36 = vmul.f32 -1.442695, %v994_v62 }
 0x36a   : > { %2543 = vpow2.f32 %v2304_v57 }
 0x36b   : > { %2545 = vpow2.f32 %v2305_v36 }
 0x36c   : > { %2547 = vtanh.f32 %v993_v61 }
 0x373   : > { %v2542_v40 = vpop.eup %2541 }
 0x374   : > { %v2544_v42 = vpop.eup %2543  ;;  %v998_v44 = vadd.f32 1.0, %v2542_v40 }
 0x375   : > { %v1004_v34 = vadd.f32 1.0, %v2544_v42  ;;  %v2546_v48 = vpop.eup %2545 }
 0x376   : > { %2549 = vrcp.f32 %v998_v44  ;;  %v2548_v31 = vpop.eup %2547  ;;  %v1011_v53 = vadd.f32 1.0, %v2546_v48 }
 0x377   : > { %2551 = vrcp.f32 %v1004_v34 }
 0x378   : > { %2553 = vrcp.f32 %v1011_v53 }
 0x380   : > { %v2550_v46 = vpop.eup %2549 }
 0x381   : > { %v2552_v50 = vpop.eup %2551  ;;  %v1015_v52 = vmul.f32 %v2550_v46, %v2548_v31 }
 0x382   : > { %v1014_v37 = vmul.f32 %v2552_v50, %v3324_v49  ;;  %v2554_v55 = vpop.eup %2553 }
 0x384   : > { %v1016_v60 = vadd.f32 %v1015_v52, %v1014_v37  ;;  %v1217_v52 = vstv %s1216_s24 }
 0x385   : > { %vm1218_vm3 = vcmp.eq.s32.totalorder %v1217_v52, 1 }
 0x386   : > { %2555 = vtanh.f32 %v1016_v60  ;;  %v3391_v54 = vsel %vm1023_vm2, %v1016_v60, %v3324_v49 }
 0x390   : > { %v2556_v41 = vpop.eup %2555 }
 0x391   : > { %v1018_v56 = vmul.f32 %v2556_v41, %v2554_v55 }
 0x393   : > { %v3394_v57 = vsel %vm1023_vm2, %v1018_v56, %v3327_v39 }
 0x394   : > { %v1027_v58 = vcombine.high %v3394_v57, %v3394_v57  ;;  %v1034_v59 = vrot.slane %v3394_v57, %v3257_v38  ;;  %v1103_v62 = vpack.c.bf16 %v3394_v57, %v3394_v57 }
 0x396   : > { %v1041_v49 = vrot.slane %v1027_v58, %v3257_v38  ;;  %v1042_v0 = vcombine.high %v1034_v59, %v1034_v59  ;;  %v1050_v36 = vrot.slane %v1034_v59, %v3257_v38  ;;  %2306 = vst.sshfl [vmem:[%s3086_s25 + $0x2] sm:$0x1 pattern:$0x73625140] %v1034_v59  ;;  %1137 = vmatmul.mubr.bf16.vlgmr.msra.gmra.mrb[12].mxu0 %v1103_v62 }
 0x397   : > { %1178 = vmatmul.mubr.bf16.vlgmr.msra.gmra.mrb[12].mxu1 %v1103_v62  ;;  %1300 = vmatpush1.bf16.msra.mxu0 %v3091_v2 }
 0x398   : > { %1341 = vmatpush1.bf16.msra.mxu1 %v3106_v8  ;;  %v1043_v39 = vcombine.high %v1041_v49, %v1041_v49  ;;  %v1057_v61 = vrot.slane %v1041_v49, %v3257_v38  ;;  %v1064_v40 = vrot.slane %v1042_v0, %v3257_v38  ;;  %v1072_v42 = vcombine.high %v1050_v36, %v1050_v36 }
 0x399   : > { %2307 = vst.sshfl [vmem:[%s3086_s25 + $0xa] sm:$0x1 pattern:$0x73625140] %v1042_v0  ;;  %1301 = vmatprep.subr.bf16.mxu0 %v3096_v4  ;;  %1342 = vmatprep.subr.bf16.mxu1 %v3116_v11  ;;  %v2310_v4 = vld [vmem:[%s3075_s14 + $0x30] sm:$0xff] }
 0x39a   : > { %2308 = vst.sshfl [vmem:[%s3086_s25 + $0x22] sm:$0x1 pattern:$0x73625140] %v1041_v49  ;;  %1331 = vmatprep.mubr.bf16.mxu0 %v2876_v3  ;;  %v1071_v2 = vrot.slane %v1043_v39, %v3257_v38  ;;  %v1073_v8 = vcombine.high %v1057_v61, %v1057_v61  ;;  %v1074_v44 = vcombine.high %v1064_v40, %v1064_v40  ;;  %1086 = vst [vmem:[%s3086_s25 + $0x12] sm:$0x1] %v1072_v42 }
 0x39b   : > { %2309 = vst.sshfl [vmem:[%s3086_s25 + $0x2a] sm:$0x1 pattern:$0x73625140] %v1043_v39  ;;  %1372 = vmatprep.mubr.bf16.mxu1 %v2876_v3  ;;  %1302 = vmatpush1.bf16.msra.mxu0 %v3099_v5  ;;  %v1095_v5 = vunpack.c.l.bf16 %v2310_v4  ;;  %v3475_v42 = vld [vmem:[#allocation7 + $0x8] ss:$16 sps:$4 sm:$0xff]  }
 0x39c   : > { %1343 = vmatpush1.bf16.msra.mxu1 %v3118_v12  ;;  %v1075_v34 = vcombine.high %v1071_v2, %v1071_v2  ;;  %1087 = vst [vmem:[%s3086_s25 + $0x1a] sm:$0x1] %v1074_v44  ;;  %1090 = vst [vmem:[%s3086_s25 + $0x32] sm:$0x1] %v1073_v8  ;;  %1303 = vmatprep.subr.bf16.mxu0 %v3102_v6  ;;  %v1096_v6 = vunpack.c.h.bf16 %v2310_v4  ;;  %v3482_v4 = vld [vmem:[#allocation7 + $0x24] ss:$16 sps:$4 sm:$0xff]  }
 0x39d   : > { %1344 = vmatprep.subr.bf16.mxu1 %v3126_v15 }
 0x39e   : > { %1091 = vst [vmem:[%s3086_s25 + $0x3a] sm:$0x1] %v1075_v34  ;;  %v1100_v11 = vadd.f32 %v1096_v6, %v3237_v45 }
 0x39f   : > { %1304 = vmatpush1.bf16.msra.mxu0 %v3109_v9  ;;  %v1099_v9 = vadd.f32 %v1095_v5, %v3235_v43  ;;  %v3485_v5 = vld [vmem:[#allocation7 + $0x2c] ss:$16 sps:$4 sm:$0xff]  }
 0x3a0   : > { %1345 = vmatpush1.bf16.msra.mxu1 %v3130_v16  ;;  %1305 = vmatprep.subr.bf16.mxu0 %v3113_v10  ;;  %v2311_v10 = vld [vmem:[%s3075_s14 + $0x38] sm:$0xff] }
 0x3a1   : > { %1346 = vmatprep.subr.bf16.mxu1 %v3133_v17 }
 0x3a3   : > { %1306 = vmatpush1.bf16.msra.mxu0 %v3122_v13 }
 0x3a4   : > { %1347 = vmatpush1.bf16.msra.mxu1 %v3142_v20  ;;  %1307 = vmatprep.subr.bf16.mxu0 %v3124_v14  ;;  %v1098_v14 = vunpack.c.h.bf16 %v2311_v10 }
 0x3a5   : > { %1348 = vmatprep.subr.bf16.mxu1 %v3145_v21 }
 0x3a7   : > { %1308 = vmatpush1.bf16.msra.mxu0 %v3136_v18 }
 0x3a8   : > { %1349 = vmatpush1.bf16.msra.mxu1 %v3154_v24  ;;  %1309 = vmatprep.subr.bf16.mxu0 %v3139_v19  ;;  %v1097_v24 = vunpack.c.l.bf16 %v2311_v10 }
 0x3a9   : > { %1350 = vmatprep.subr.bf16.mxu1 %v3157_v25 }
 0x3ab   : > { %1310 = vmatpush1.bf16.msra.mxu0 %v3147_v22 }
 0x3ac   : > { %1351 = vmatpush1.bf16.msra.mxu1 %v3166_v28  ;;  %1311 = vmatprep.subr.bf16.mxu0 %v3150_v23  ;;  %v1102_v23 = vadd.f32 %v1098_v14, %v3243_v51  ;;  %v3501_v14 = vld [vmem:[#allocation7 + $0x44] ss:$16 sps:$4 sm:$0xff]  }
 0x3ad   : > { %1352 = vmatprep.subr.bf16.mxu1 %v3169_v29 }
 0x3af   : > { %1312 = vmatpush1.bf16.msra.mxu0 %v3160_v26  ;;  %v1101_v26 = vadd.f32 %v1097_v24, %v3247_v63  ;;  %v3538_v24 = vld [vmem:[#allocation7 + $0xa4] ss:$16 sps:$4 sm:$0xff]  }
 0x3b0   : > { %1353 = vmatpush1.bf16.msra.mxu1 %v3178_v32  ;;  %1313 = vmatprep.subr.bf16.mxu0 %v3163_v27 }
 0x3b1   : > { %1354 = vmatprep.subr.bf16.mxu1 %v3181_v33 }
 0x3b3   : > { %1314 = vmatpush1.bf16.msra.mxu0 %v3172_v30 }
 0x3b4   : > { %1355 = vmatpush1.bf16.msra.mxu1 %v3187_v35  ;;  %1494 = vmatprep.subr.bf16.mxu0 %v3089_v1 }
 0x3b5   : > { %1535 = vmatprep.subr.bf16.mxu1 %v3104_v7 }
 0x469   : > { %v1138_v12 = vpop.f32.mrb[12].mxu0 }
 0x46a   : > { %v1179_v13 = vpop.f32.mrb[12].mxu1  ;;  %v1186_v15 = vadd.f32 %v1138_v12, %v1099_v9  ;;  %v1140_v16 = vpop.f32.mrb[13].mxu0  ;;  %v3496_v12 = vld [vmem:[#allocation7 + $0x28] ss:$16 sps:$4 sm:$0xff]  }
 0x46b   : > { %v1181_v17 = vpop.f32.mrb[13].mxu1  ;;  %v1187_v18 = vadd.f32 %v1140_v16, %v1100_v11  ;;  %v1142_v19 = vpop.f32.mrb[14].mxu0  ;;  %v1188_v28 = vadd.f32 %v1179_v13, %v1101_v26  ;;  %v3493_v11 = vld [vmem:[#allocation7 + $0x20] ss:$16 sps:$4 sm:$0xff]  }
 0x46c   : > { %v1183_v20 = vpop.f32.mrb[14].mxu1  ;;  %v2312_v1 = vmul.f32 -1.442695, %v1186_v15  ;;  %v1143_v21 = vpop.f32.mrb[15].mxu0  ;;  %v1189_v25 = vadd.f32 %v1181_v17, %v1102_v23  ;;  %v3504_v15 = vld [vmem:[#allocation7 + $0x4c] ss:$16 sps:$4 sm:$0xff]  }
 0x46d   : > { %v1184_v7 = vpop.f32.mrb[15].mxu1  ;;  %v2313_v22 = vmul.f32 -1.442695, %v1187_v18  ;;  %v3508_v16 = vld [vmem:[#allocation7 + $0x40] ss:$16 sps:$4 sm:$0xff]  }
 0x46e   : > { %2557 = vpow2.f32 %v2312_v1  ;;  %v2314_v27 = vmul.f32 -1.442695, %v1189_v25  ;;  %v3511_v17 = vld [vmem:[#allocation7 + $0x48] ss:$16 sps:$4 sm:$0xff]   ;;  %v3514_v18 = vld [vmem:[#allocation7 + $0x64] ss:$16 sps:$4 sm:$0xff]  }
 0x46f   : > { %2559 = vpow2.f32 %v2313_v22  ;;  %v3517_v19 = vld [vmem:[#allocation7 + $0x6c] ss:$16 sps:$4 sm:$0xff]   ;;  %v3520_v20 = vld [vmem:[#allocation7 + $0x60] ss:$16 sps:$4 sm:$0xff]   ;;  %v3523_v1 = vld [vmem:[#allocation7 + $0x68] ss:$16 sps:$4 sm:$0xff]  }
 0x470   : > { %2561 = vpow2.f32 %v2314_v27  ;;  %v3526_v21 = vld [vmem:[#allocation7 + $0x84] ss:$16 sps:$4 sm:$0xff]   ;;  %v3529_v7 = vld [vmem:[#allocation7 + $0x8c] ss:$16 sps:$4 sm:$0xff]   ;;  %v3532_v22 = vld [vmem:[#allocation7 + $0x80] ss:$16 sps:$4 sm:$0xff]  }
 0x471   : > { %2563 = vtanh.f32 %v1188_v28  ;;  %v3535_v23 = vld [vmem:[#allocation7 + $0x88] ss:$16 sps:$4 sm:$0xff]   ;;  %v3541_v25 = vld [vmem:[#allocation7 + $0xac] ss:$16 sps:$4 sm:$0xff]   ;;  %v3544_v26 = vld [vmem:[#allocation7 + $0xa0] ss:$16 sps:$4 sm:$0xff]  }
 0x472   : > { %v3547_v27 = vld [vmem:[#allocation7 + $0xa8] ss:$16 sps:$4 sm:$0xff]   ;;  %v3550_v28 = vld [vmem:[#allocation7 + $0xc4] ss:$16 sps:$4 sm:$0xff]  }
 0x478   : > { %v2558_v29 = vpop.eup %2557 }
 0x479   : > { %v2560_v30 = vpop.eup %2559  ;;  %v1193_v48 = vadd.f32 1.0, %v2558_v29  ;;  %v3553_v29 = vld [vmem:[#allocation7 + $0xcc] ss:$16 sps:$4 sm:$0xff]  }
 0x47a   : > { %v1199_v31 = vadd.f32 1.0, %v2560_v30  ;;  %v2562_v46 = vpop.eup %2561  ;;  %v3556_v30 = vld [vmem:[#allocation7 + $0xc0] ss:$16 sps:$4 sm:$0xff]  }
 0x47b   : > { %2565 = vrcp.f32 %v1193_v48  ;;  %v2564_v47 = vpop.eup %2563  ;;  %v1206_v60 = vadd.f32 1.0, %v2562_v46  ;;  %v3560_v48 = vld [vmem:[#allocation7 + $0xe4] ss:$16 sps:$4 sm:$0xff]  }
 0x47c   : > { %2567 = vrcp.f32 %v1199_v31  ;;  %v3564_v31 = vld [vmem:[#allocation7 + $0xe0] ss:$16 sps:$4 sm:$0xff]   ;;  %v3568_v46 = vld [vmem:[#allocation7 + $0x4] ss:$16 sps:$4 sm:$0xff]  }
 0x47d   : > { %2569 = vrcp.f32 %v1206_v60 }
 0x485   : > { %v2566_v50 = vpop.eup %2565 }
 0x486   : > { %v2568_v53 = vpop.eup %2567  ;;  %v1210_v37 = vmul.f32 %v2566_v50, %v2564_v47  ;;  %v3571_v47 = vld [vmem:[#allocation7 + $0xc] ss:$16 sps:$4 sm:$0xff]  }
 0x487   : > { %v1209_v55 = vmul.f32 %v2568_v53, %v3391_v54  ;;  %v2570_v58 = vpop.eup %2569 }
 0x489   : > { %v1211_v41 = vadd.f32 %v1210_v37, %v1209_v55 }
 0x48b   : > { %2571 = vtanh.f32 %v1211_v41  ;;  %v3458_v56 = vsel %vm1218_vm3, %v1211_v41, %v3391_v54 }
 0x495   : > { %v2572_v59 = vpop.eup %2571 }
 0x496   : > { %v1213_v62 = vmul.f32 %v2572_v59, %v2570_v58 }
 0x498   : > { %v3461_v49 = vsel %vm1218_vm3, %v1213_v62, %v3394_v57  ;;  %v3472_v57 = vld [vmem:[#allocation7] ss:$16 sps:$4 sm:$0xff]  }
 0x499   : > { %v1222_v0 = vcombine.high %v3461_v49, %v3461_v49  ;;  %v1229_v36 = vrot.slane %v3461_v49, %v3257_v38  ;;  %v1298_v39 = vpack.c.bf16 %v3461_v49, %v3461_v49 }
 0x49b   : > { %v1236_v54 = vrot.slane %v1222_v0, %v3257_v38  ;;  %v1237_v61 = vcombine.high %v1229_v36, %v1229_v36  ;;  %v1245_v40 = vrot.slane %v1229_v36, %v3257_v38  ;;  %2315 = vst.sshfl [vmem:[%s3086_s25 + $0x3] sm:$0x1 pattern:$0x73625140] %v1229_v36  ;;  %1332 = vmatmul.mubr.bf16.vlgmr.msra.gmra.mrb[16].mxu0 %v1298_v39 }
 0x49c   : > { %1373 = vmatmul.mubr.bf16.vlgmr.msra.gmra.mrb[16].mxu1 %v1298_v39  ;;  %1495 = vmatpush1.bf16.msra.mxu0 %v3472_v57 }
 0x49d   : > { %1536 = vmatpush1.bf16.msra.mxu1 %v3475_v42  ;;  %v1238_v2 = vcombine.high %v1236_v54, %v1236_v54  ;;  %v1252_v8 = vrot.slane %v1236_v54, %v3257_v38  ;;  %v1259_v44 = vrot.slane %v1237_v61, %v3257_v38  ;;  %v1267_v34 = vcombine.high %v1245_v40, %v1245_v40 }
 0x49e   : > { %2316 = vst.sshfl [vmem:[%s3086_s25 + $0xb] sm:$0x1 pattern:$0x73625140] %v1237_v61  ;;  %1496 = vmatprep.subr.bf16.mxu0 %v3482_v4  ;;  %1537 = vmatprep.subr.bf16.mxu1 %v3485_v5 }
 0x49f   : > { %2317 = vst.sshfl [vmem:[%s3086_s25 + $0x23] sm:$0x1 pattern:$0x73625140] %v1236_v54  ;;  %1526 = vmatprep.mubr.bf16.mxu0 %v2876_v3  ;;  %v1266_v6 = vrot.slane %v1238_v2, %v3257_v38  ;;  %v1268_v9 = vcombine.high %v1252_v8, %v1252_v8  ;;  %v1269_v10 = vcombine.high %v1259_v44, %v1259_v44  ;;  %1281 = vst [vmem:[%s3086_s25 + $0x13] sm:$0x1] %v1267_v34 }
 0x4a0   : > { %2318 = vst.sshfl [vmem:[%s3086_s25 + $0x2b] sm:$0x1 pattern:$0x73625140] %v1238_v2  ;;  %1567 = vmatprep.mubr.bf16.mxu1 %v2876_v3  ;;  %1497 = vmatpush1.bf16.msra.mxu0 %v3493_v11 }
 0x4a1   : > { %1538 = vmatpush1.bf16.msra.mxu1 %v3496_v12  ;;  %v1270_v13 = vcombine.high %v1266_v6, %v1266_v6  ;;  %1282 = vst [vmem:[%s3086_s25 + $0x1b] sm:$0x1] %v1269_v10  ;;  %1285 = vst [vmem:[%s3086_s25 + $0x33] sm:$0x1] %v1268_v9  ;;  %1498 = vmatprep.subr.bf16.mxu0 %v3501_v14 }
 0x4a2   : > { %1539 = vmatprep.subr.bf16.mxu1 %v3504_v15 }
 0x4a3   : > { %1286 = vst [vmem:[%s3086_s25 + $0x3b] sm:$0x1] %v1270_v13 }
 0x4a4   : > { %1499 = vmatpush1.bf16.msra.mxu0 %v3508_v16 }
 0x4a5   : > { %1540 = vmatpush1.bf16.msra.mxu1 %v3511_v17  ;;  %1500 = vmatprep.subr.bf16.mxu0 %v3514_v18 }
 0x4a6   : > { %1541 = vmatprep.subr.bf16.mxu1 %v3517_v19 }
 0x4a8   : > { %1501 = vmatpush1.bf16.msra.mxu0 %v3520_v20 }
 0x4a9   : > { %1542 = vmatpush1.bf16.msra.mxu1 %v3523_v1  ;;  %1502 = vmatprep.subr.bf16.mxu0 %v3526_v21 }
 0x4aa   : > { %1543 = vmatprep.subr.bf16.mxu1 %v3529_v7 }
 0x4ac   : > { %1503 = vmatpush1.bf16.msra.mxu0 %v3532_v22 }
 0x4ad   : > { %1544 = vmatpush1.bf16.msra.mxu1 %v3535_v23  ;;  %1504 = vmatprep.subr.bf16.mxu0 %v3538_v24 }
 0x4ae   : > { %1545 = vmatprep.subr.bf16.mxu1 %v3541_v25 }
 0x4b0   : > { %1505 = vmatpush1.bf16.msra.mxu0 %v3544_v26 }
 0x4b1   : > { %1546 = vmatpush1.bf16.msra.mxu1 %v3547_v27  ;;  %1506 = vmatprep.subr.bf16.mxu0 %v3550_v28 }
 0x4b2   : > { %1547 = vmatprep.subr.bf16.mxu1 %v3553_v29 }
 0x4b4   : > { %1507 = vmatpush1.bf16.msra.mxu0 %v3556_v30 }
 0x4b5   : > { %1548 = vmatpush1.bf16.msra.mxu1 %v3178_v32  ;;  %1508 = vmatprep.subr.bf16.mxu0 %v3560_v48  ;;  %v2319_v32 = vld [vmem:[%s3075_s14 + $0x40] sm:$0xff] }
 0x4b6   : > { %1549 = vmatprep.subr.bf16.mxu1 %v3181_v33  ;;  %v1290_v50 = vunpack.c.l.bf16 %v2319_v32  ;;  %v1291_v52 = vunpack.c.h.bf16 %v2319_v32  ;;  %v2320_v33 = vld [vmem:[%s3075_s14 + $0x48] sm:$0xff] }
 0x4b7   : > { %v1293_v41 = vunpack.c.h.bf16 %v2320_v33  ;;  %v1292_v8 = vunpack.c.l.bf16 %v2320_v33 }
 0x4b8   : > { %1509 = vmatpush1.bf16.msra.mxu0 %v3564_v31  ;;  %v1294_v53 = vadd.f32 %v1290_v50, %v3235_v43  ;;  %v1295_v37 = vadd.f32 %v1291_v52, %v3237_v45 }
 0x4b9   : > { %1550 = vmatpush1.bf16.msra.mxu1 %v3187_v35  ;;  %1689 = vmatprep.subr.bf16.mxu0 %v3568_v46  ;;  %v1297_v2 = vadd.f32 %v1293_v41, %v3243_v51  ;;  %v1296_v34 = vadd.f32 %v1292_v8, %v3247_v63 }
 0x4ba   : > { %1730 = vmatprep.subr.bf16.mxu1 %v3571_v47 }
 0x56e   : > { %v1333_v60 = vpop.f32.mrb[16].mxu0 }
 0x56f   : > { %v1374_v55 = vpop.f32.mrb[16].mxu1  ;;  %v1381_v35 = vadd.f32 %v1333_v60, %v1294_v53  ;;  %v1335_v58 = vpop.f32.mrb[17].mxu0 }
 0x570   : > { %v1376_v59 = vpop.f32.mrb[17].mxu1  ;;  %v1382_v62 = vadd.f32 %v1335_v58, %v1295_v37  ;;  %v1337_v0 = vpop.f32.mrb[18].mxu0  ;;  %v1383_v9 = vadd.f32 %v1374_v55, %v1296_v34  ;;  %v1412_v37 = vstv %s1411_s26 }
 0x571   : > { %v1378_v36 = vpop.f32.mrb[18].mxu1  ;;  %v2321_v39 = vmul.f32 -1.442695, %v1381_v35  ;;  %v1338_v54 = vpop.f32.mrb[19].mxu0  ;;  %v1384_v44 = vadd.f32 %v1376_v59, %v1297_v2  ;;  %vm1413_vm4 = vcmp.eq.s32.totalorder %v1412_v37, 1 }
 0x572   : > { %v1379_v61 = vpop.f32.mrb[19].mxu1  ;;  %v2322_v40 = vmul.f32 -1.442695, %v1382_v62 }
 0x573   : > { %2573 = vpow2.f32 %v2321_v39  ;;  %v2323_v6 = vmul.f32 -1.442695, %v1384_v44 }
 0x574   : > { %2575 = vpow2.f32 %v2322_v40 }
 0x575   : > { %2577 = vpow2.f32 %v2323_v6 }
 0x576   : > { %2579 = vtanh.f32 %v1383_v9 }
 0x57d   : > { %v2574_v10 = vpop.eup %2573 }
 0x57e   : > { %v2576_v13 = vpop.eup %2575  ;;  %v1388_v32 = vadd.f32 1.0, %v2574_v10 }
 0x57f   : > { %v1394_v50 = vadd.f32 1.0, %v2576_v13  ;;  %v2578_v52 = vpop.eup %2577 }
 0x580   : > { %2581 = vrcp.f32 %v1388_v32  ;;  %v2580_v53 = vpop.eup %2579  ;;  %v1401_v35 = vadd.f32 1.0, %v2578_v52  ;;  %v3638_v52 = vld [vmem:[#allocation7 + $0xec] ss:$16 sps:$4 sm:$0xff]  }
 0x581   : > { %2583 = vrcp.f32 %v1394_v50  ;;  %v3634_v50 = vld [vmem:[#allocation7 + $0xc8] ss:$16 sps:$4 sm:$0xff]  }
 0x582   : > { %2585 = vrcp.f32 %v1401_v35  ;;  %v2329_v35 = vld [vmem:[%s3075_s14 + $0x58] sm:$0xff] }
 0x58a   : > { %v2582_v33 = vpop.eup %2581 }
 0x58b   : > { %v2584_v60 = vpop.eup %2583  ;;  %v1405_v41 = vmul.f32 %v2582_v33, %v2580_v53  ;;  %v3642_v53 = vld [vmem:[#allocation7 + $0xe8] ss:$16 sps:$4 sm:$0xff]   ;;  %v2328_v33 = vld [vmem:[%s3075_s14 + $0x50] sm:$0xff] }
 0x58c   : > { %v1404_v55 = vmul.f32 %v2584_v60, %v3458_v56  ;;  %v2586_v62 = vpop.eup %2585  ;;  %v1485_v37 = vunpack.c.l.bf16 %v2328_v33  ;;  %v1486_v60 = vunpack.c.h.bf16 %v2328_v33 }
 0x58e   : > { %v1406_v58 = vadd.f32 %v1405_v41, %v1404_v55  ;;  %v1489_v41 = vadd.f32 %v1485_v37, %v3235_v43  ;;  %v1490_v55 = vadd.f32 %v1486_v60, %v3237_v45 }
 0x590   : > { %2587 = vtanh.f32 %v1406_v58  ;;  %v3583_v59 = vsel %vm1413_vm4, %v1406_v58, %v3458_v56 }
 0x59a   : > { %v2588_v0 = vpop.eup %2587 }
 0x59b   : > { %v1408_v36 = vmul.f32 %v2588_v0, %v2586_v62  ;;  %v1488_v0 = vunpack.c.h.bf16 %v2329_v35 }
 0x59d   : > { %v3586_v39 = vsel %vm1413_vm4, %v1408_v36, %v3461_v49 }
 0x59e   : > { %v1417_v54 = vcombine.high %v3586_v39, %v3586_v39  ;;  %v1424_v61 = vrot.slane %v3586_v39, %v3257_v38  ;;  %v1493_v40 = vpack.c.bf16 %v3586_v39, %v3586_v39 }
 0x5a0   : > { %v1431_v56 = vrot.slane %v1417_v54, %v3257_v38  ;;  %v1432_v2 = vcombine.high %v1424_v61, %v1424_v61  ;;  %v1440_v8 = vrot.slane %v1424_v61, %v3257_v38  ;;  %2324 = vst.sshfl [vmem:[%s3086_s25 + $0x4] sm:$0x1 pattern:$0x73625140] %v1424_v61  ;;  %1527 = vmatmul.mubr.bf16.vlgmr.msra.gmra.mrb[20].mxu0 %v1493_v40 }
 0x5a1   : > { %1568 = vmatmul.mubr.bf16.vlgmr.msra.gmra.mrb[20].mxu1 %v1493_v40  ;;  %1690 = vmatpush1.bf16.msra.mxu0 %v3472_v57 }
 0x5a2   : > { %1731 = vmatpush1.bf16.msra.mxu1 %v3475_v42  ;;  %v1433_v49 = vcombine.high %v1431_v56, %v1431_v56  ;;  %v1447_v44 = vrot.slane %v1431_v56, %v3257_v38  ;;  %v1454_v34 = vrot.slane %v1432_v2, %v3257_v38  ;;  %v1462_v6 = vcombine.high %v1440_v8, %v1440_v8 }
 0x5a3   : > { %2325 = vst.sshfl [vmem:[%s3086_s25 + $0xc] sm:$0x1 pattern:$0x73625140] %v1432_v2  ;;  %1691 = vmatprep.subr.bf16.mxu0 %v3482_v4  ;;  %1732 = vmatprep.subr.bf16.mxu1 %v3485_v5 }
 0x5a4   : > { %2326 = vst.sshfl [vmem:[%s3086_s25 + $0x24] sm:$0x1 pattern:$0x73625140] %v1431_v56  ;;  %1721 = vmatprep.mubr.bf16.mxu0 %v2876_v3  ;;  %v1461_v9 = vrot.slane %v1433_v49, %v3257_v38  ;;  %v1463_v10 = vcombine.high %v1447_v44, %v1447_v44  ;;  %v1464_v13 = vcombine.high %v1454_v34, %v1454_v34  ;;  %1476 = vst [vmem:[%s3086_s25 + $0x14] sm:$0x1] %v1462_v6 }
 0x5a5   : > { %2327 = vst.sshfl [vmem:[%s3086_s25 + $0x2c] sm:$0x1 pattern:$0x73625140] %v1433_v49  ;;  %1762 = vmatprep.mubr.bf16.mxu1 %v2876_v3  ;;  %1692 = vmatpush1.bf16.msra.mxu0 %v3493_v11  ;;  %v1492_v44 = vadd.f32 %v1488_v0, %v3243_v51  ;;  %v1487_v34 = vunpack.c.l.bf16 %v2329_v35 }
 0x5a6   : > { %1733 = vmatpush1.bf16.msra.mxu1 %v3496_v12  ;;  %v1465_v32 = vcombine.high %v1461_v9, %v1461_v9  ;;  %1477 = vst [vmem:[%s3086_s25 + $0x1c] sm:$0x1] %v1464_v13  ;;  %1480 = vst [vmem:[%s3086_s25 + $0x34] sm:$0x1] %v1463_v10  ;;  %1693 = vmatprep.subr.bf16.mxu0 %v3501_v14 }
 0x5a7   : > { %1734 = vmatprep.subr.bf16.mxu1 %v3504_v15  ;;  %v1491_v9 = vadd.f32 %v1487_v34, %v3247_v63 }
 0x5a8   : > { %1481 = vst [vmem:[%s3086_s25 + $0x3c] sm:$0x1] %v1465_v32 }
 0x5a9   : > { %1694 = vmatpush1.bf16.msra.mxu0 %v3508_v16 }
 0x5aa   : > { %1735 = vmatpush1.bf16.msra.mxu1 %v3511_v17  ;;  %1695 = vmatprep.subr.bf16.mxu0 %v3514_v18 }
 0x5ab   : > { %1736 = vmatprep.subr.bf16.mxu1 %v3517_v19 }
 0x5ad   : > { %1696 = vmatpush1.bf16.msra.mxu0 %v3520_v20 }
 0x5ae   : > { %1737 = vmatpush1.bf16.msra.mxu1 %v3523_v1  ;;  %1697 = vmatprep.subr.bf16.mxu0 %v3526_v21 }
 0x5af   : > { %1738 = vmatprep.subr.bf16.mxu1 %v3529_v7 }
 0x5b1   : > { %1698 = vmatpush1.bf16.msra.mxu0 %v3532_v22 }
 0x5b2   : > { %1739 = vmatpush1.bf16.msra.mxu1 %v3535_v23  ;;  %1699 = vmatprep.subr.bf16.mxu0 %v3538_v24 }
 0x5b3   : > { %1740 = vmatprep.subr.bf16.mxu1 %v3541_v25 }
 0x5b5   : > { %1700 = vmatpush1.bf16.msra.mxu0 %v3544_v26 }
 0x5b6   : > { %1741 = vmatpush1.bf16.msra.mxu1 %v3547_v27  ;;  %1701 = vmatprep.subr.bf16.mxu0 %v3550_v28 }
 0x5b7   : > { %1742 = vmatprep.subr.bf16.mxu1 %v3553_v29 }
 0x5b9   : > { %1702 = vmatpush1.bf16.msra.mxu0 %v3556_v30 }
 0x5ba   : > { %1743 = vmatpush1.bf16.msra.mxu1 %v3634_v50  ;;  %1703 = vmatprep.subr.bf16.mxu0 %v3560_v48 }
 0x5bb   : > { %1744 = vmatprep.subr.bf16.mxu1 %v3638_v52 }
 0x5bd   : > { %1704 = vmatpush1.bf16.msra.mxu0 %v3564_v31 }
 0x5be   : > { %1745 = vmatpush1.bf16.msra.mxu1 %v3642_v53  ;;  %1884 = vmatprep.subr.bf16.mxu0 %v3568_v46 }
 0x5bf   : > { %1925 = vmatprep.subr.bf16.mxu1 %v3571_v47 }
 0x673   : > { %v1528_v58 = vpop.f32.mrb[20].mxu0 }
 0x674   : > { %v1569_v62 = vpop.f32.mrb[20].mxu1  ;;  %v1576_v36 = vadd.f32 %v1528_v58, %v1489_v41  ;;  %v1530_v54 = vpop.f32.mrb[21].mxu0  ;;  %v1607_v58 = vstv %s1606_s13 }
 0x675   : > { %v1571_v61 = vpop.f32.mrb[21].mxu1  ;;  %v1577_v40 = vadd.f32 %v1530_v54, %v1490_v55  ;;  %v1532_v56 = vpop.f32.mrb[22].mxu0  ;;  %v1578_v13 = vadd.f32 %v1569_v62, %v1491_v9  ;;  %vm1608_vm5 = vcmp.eq.s32.totalorder %v1607_v58, 1 }
 0x676   : > { %v1573_v2 = vpop.f32.mrb[22].mxu1  ;;  %v2330_v46 = vmul.f32 -1.442695, %v1576_v36  ;;  %v1533_v8 = vpop.f32.mrb[23].mxu0  ;;  %v1579_v6 = vadd.f32 %v1571_v61, %v1492_v44 }
 0x677   : > { %v1574_v47 = vpop.f32.mrb[23].mxu1  ;;  %v2331_v49 = vmul.f32 -1.442695, %v1577_v40 }
 0x678   : > { %2589 = vpow2.f32 %v2330_v46  ;;  %v2332_v10 = vmul.f32 -1.442695, %v1579_v6 }
 0x679   : > { %2591 = vpow2.f32 %v2331_v49 }
 0x67a   : > { %2593 = vpow2.f32 %v2332_v10 }
 0x67b   : > { %2595 = vtanh.f32 %v1578_v13 }
 0x682   : > { %v2590_v32 = vpop.eup %2589 }
 0x683   : > { %v2592_v33 = vpop.eup %2591  ;;  %v1583_v37 = vadd.f32 1.0, %v2590_v32 }
 0x684   : > { %v1589_v60 = vadd.f32 1.0, %v2592_v33  ;;  %v2594_v41 = vpop.eup %2593 }
 0x685   : > { %2597 = vrcp.f32 %v1583_v37  ;;  %v2596_v55 = vpop.eup %2595  ;;  %v1596_v54 = vadd.f32 1.0, %v2594_v41 }
 0x686   : > { %2599 = vrcp.f32 %v1589_v60 }
 0x687   : > { %2601 = vrcp.f32 %v1596_v54 }
 0x68f   : > { %v2598_v35 = vpop.eup %2597 }
 0x690   : > { %v2600_v0 = vpop.eup %2599  ;;  %v1600_v36 = vmul.f32 %v2598_v35, %v2596_v55  ;;  %v1802_v55 = vstv %s1801_s16 }
 0x691   : > { %v1599_v62 = vmul.f32 %v2600_v0, %v3583_v59  ;;  %v2602_v56 = vpop.eup %2601  ;;  %vm1803_vm6 = vcmp.eq.s32.totalorder %v1802_v55, 1 }
 0x693   : > { %v1601_v61 = vadd.f32 %v1600_v36, %v1599_v62 }
 0x695   : > { %2603 = vtanh.f32 %v1601_v61  ;;  %v3656_v40 = vsel %vm1608_vm5, %v1601_v61, %v3583_v59 }
 0x69f   : > { %v2604_v2 = vpop.eup %2603 }
 0x6a0   : > { %v1603_v46 = vmul.f32 %v2604_v2, %v2602_v56 }
 0x6a2   : > { %v3659_v8 = vsel %vm1608_vm5, %v1603_v46, %v3586_v39 }
 0x6a3   : > { %v1612_v47 = vcombine.high %v3659_v8, %v3659_v8  ;;  %v1619_v49 = vrot.slane %v3659_v8, %v3257_v38  ;;  %v1688_v44 = vpack.c.bf16 %v3659_v8, %v3659_v8 }
 0x6a5   : > { %v1626_v59 = vrot.slane %v1612_v47, %v3257_v38  ;;  %v1627_v34 = vcombine.high %v1619_v49, %v1619_v49  ;;  %v1635_v6 = vrot.slane %v1619_v49, %v3257_v38  ;;  %2333 = vst.sshfl [vmem:[%s3086_s25 + $0x5] sm:$0x1 pattern:$0x73625140] %v1619_v49  ;;  %1722 = vmatmul.mubr.bf16.vlgmr.msra.gmra.mrb[24].mxu0 %v1688_v44 }
 0x6a6   : > { %1763 = vmatmul.mubr.bf16.vlgmr.msra.gmra.mrb[24].mxu1 %v1688_v44  ;;  %1885 = vmatpush1.bf16.msra.mxu0 %v3472_v57 }
 0x6a7   : > { %1926 = vmatpush1.bf16.msra.mxu1 %v3475_v42  ;;  %v1628_v39 = vcombine.high %v1626_v59, %v1626_v59  ;;  %v1642_v9 = vrot.slane %v1626_v59, %v3257_v38  ;;  %v1649_v10 = vrot.slane %v1627_v34, %v3257_v38  ;;  %v1657_v13 = vcombine.high %v1635_v6, %v1635_v6 }
 0x6a8   : > { %2334 = vst.sshfl [vmem:[%s3086_s25 + $0xd] sm:$0x1 pattern:$0x73625140] %v1627_v34  ;;  %1886 = vmatprep.subr.bf16.mxu0 %v3482_v4  ;;  %1927 = vmatprep.subr.bf16.mxu1 %v3485_v5 }
 0x6a9   : > { %2335 = vst.sshfl [vmem:[%s3086_s25 + $0x25] sm:$0x1 pattern:$0x73625140] %v1626_v59  ;;  %1916 = vmatprep.mubr.bf16.mxu0 %v2876_v3  ;;  %v1656_v57 = vrot.slane %v1628_v39, %v3257_v38  ;;  %v1658_v42 = vcombine.high %v1642_v9, %v1642_v9  ;;  %v1659_v32 = vcombine.high %v1649_v10, %v1649_v10  ;;  %1671 = vst [vmem:[%s3086_s25 + $0x15] sm:$0x1] %v1657_v13 }
 0x6aa   : > { %2336 = vst.sshfl [vmem:[%s3086_s25 + $0x2d] sm:$0x1 pattern:$0x73625140] %v1628_v39  ;;  %1957 = vmatprep.mubr.bf16.mxu1 %v2876_v3  ;;  %1887 = vmatpush1.bf16.msra.mxu0 %v3493_v11  ;;  %v2337_v3 = vld [vmem:[%s3075_s14 + $0x60] sm:$0xff] }
 0x6ab   : > { %1928 = vmatpush1.bf16.msra.mxu1 %v3496_v12  ;;  %v1660_v33 = vcombine.high %v1656_v57, %v1656_v57  ;;  %1672 = vst [vmem:[%s3086_s25 + $0x1d] sm:$0x1] %v1659_v32  ;;  %1675 = vst [vmem:[%s3086_s25 + $0x35] sm:$0x1] %v1658_v42  ;;  %1888 = vmatprep.subr.bf16.mxu0 %v3501_v14  ;;  %v1680_v4 = vunpack.c.l.bf16 %v2337_v3  ;;  %v1681_v5 = vunpack.c.h.bf16 %v2337_v3  ;;  %v2338_v12 = vld [vmem:[%s3075_s14 + $0x68] sm:$0xff]  ;;  %v2346_v32 = vld [vmem:[%s3075_s14 + $0x70] sm:$0xff] }
 0x6ac   : > { %1929 = vmatprep.subr.bf16.mxu1 %v3504_v15  ;;  %v1876_v3 = vunpack.c.h.bf16 %v2346_v32 }
 0x6ad   : > { %1676 = vst [vmem:[%s3086_s25 + $0x3d] sm:$0x1] %v1660_v33  ;;  %v1684_v11 = vadd.f32 %v1680_v4, %v3235_v43  ;;  %v1685_v14 = vadd.f32 %v1681_v5, %v3237_v45  ;;  %v1875_v33 = vunpack.c.l.bf16 %v2346_v32  ;;  %v2347_v5 = vld [vmem:[%s3075_s14 + $0x78] sm:$0xff]  ;;  %s1994_s14 = sadd.s32 7, %s3251_s10 }
 0x6ae   : > { %1889 = vmatpush1.bf16.msra.mxu0 %v3508_v16  ;;  %p1995_p1 = scmp.lt.s32.totalorder %s1994_s14, 20 }
 0x6af   : > { %1930 = vmatpush1.bf16.msra.mxu1 %v3511_v17  ;;  %1890 = vmatprep.subr.bf16.mxu0 %v3514_v18  ;;  %v1683_v17 = vunpack.c.h.bf16 %v2338_v12  ;;  %v1879_v4 = vadd.f32 %v1875_v33, %v3235_v43  ;;  %v1877_v43 = vunpack.c.l.bf16 %v2347_v5 }
 0x6b0   : > { %1931 = vmatprep.subr.bf16.mxu1 %v3517_v19  ;;  %s1996_s17 = scalar_select %p1995_p1, 1, 0 }
 0x6b2   : > { %1891 = vmatpush1.bf16.msra.mxu0 %v3520_v20 }
 0x6b3   : > { %1932 = vmatpush1.bf16.msra.mxu1 %v3523_v1  ;;  %1892 = vmatprep.subr.bf16.mxu0 %v3526_v21 }
 0x6b4   : > { %1933 = vmatprep.subr.bf16.mxu1 %v3529_v7 }
 0x6b6   : > { %1893 = vmatpush1.bf16.msra.mxu0 %v3532_v22 }
 0x6b7   : > { %1934 = vmatpush1.bf16.msra.mxu1 %v3535_v23  ;;  %1894 = vmatprep.subr.bf16.mxu0 %v3538_v24 }
 0x6b8   : > { %1935 = vmatprep.subr.bf16.mxu1 %v3541_v25 }
 0x6ba   : > { %1895 = vmatpush1.bf16.msra.mxu0 %v3544_v26  ;;  %v1687_v26 = vadd.f32 %v1683_v17, %v3243_v51 }
 0x6bb   : > { %1936 = vmatpush1.bf16.msra.mxu1 %v3547_v27  ;;  %1896 = vmatprep.subr.bf16.mxu0 %v3550_v28  ;;  %v1682_v27 = vunpack.c.l.bf16 %v2338_v12 }
 0x6bc   : > { %1937 = vmatprep.subr.bf16.mxu1 %v3553_v29 }
 0x6bd   : > { %v1686_v29 = vadd.f32 %v1682_v27, %v3247_v63 }
 0x6be   : > { %1897 = vmatpush1.bf16.msra.mxu0 %v3556_v30 }
 0x6bf   : > { %1938 = vmatpush1.bf16.msra.mxu1 %v3634_v50  ;;  %1898 = vmatprep.subr.bf16.mxu0 %v3560_v48 }
 0x6c0   : > { %1939 = vmatprep.subr.bf16.mxu1 %v3638_v52 }
 0x6c2   : > { %1899 = vmatpush1.bf16.msra.mxu0 %v3564_v31 }
 0x6c3   : > { %1940 = vmatpush1.bf16.msra.mxu1 %v3642_v53 }
 0x778   : > { %v1723_v15 = vpop.f32.mrb[24].mxu0 }
 0x779   : > { %v1764_v16 = vpop.f32.mrb[24].mxu1  ;;  %v1771_v18 = vadd.f32 %v1723_v15, %v1684_v11  ;;  %v1725_v19 = vpop.f32.mrb[25].mxu0  ;;  %v1880_v11 = vadd.f32 %v1876_v3, %v3237_v45  ;;  %v1878_v15 = vunpack.c.h.bf16 %v2347_v5 }
 0x77a   : > { %v1766_v20 = vpop.f32.mrb[25].mxu1  ;;  %v1772_v1 = vadd.f32 %v1725_v19, %v1685_v14  ;;  %v1727_v21 = vpop.f32.mrb[26].mxu0  ;;  %v1773_v48 = vadd.f32 %v1764_v16, %v1686_v29 }
 0x77b   : > { %v1768_v7 = vpop.f32.mrb[26].mxu1  ;;  %v2339_v22 = vmul.f32 -1.442695, %v1771_v18  ;;  %v1728_v23 = vpop.f32.mrb[27].mxu0  ;;  %v1774_v28 = vadd.f32 %v1766_v20, %v1687_v26 }
 0x77c   : > { %v1769_v24 = vpop.f32.mrb[27].mxu1  ;;  %v2340_v25 = vmul.f32 -1.442695, %v1772_v1 }
 0x77d   : > { %2605 = vpow2.f32 %v2339_v22  ;;  %v2341_v30 = vmul.f32 -1.442695, %v1774_v28  ;;  %v1882_v24 = vadd.f32 %v1878_v15, %v3243_v51 }
 0x77e   : > { %2607 = vpow2.f32 %v2340_v25  ;;  %v1881_v25 = vadd.f32 %v1877_v43, %v3247_v63 }
 0x77f   : > { %2609 = vpow2.f32 %v2341_v30 }
 0x780   : > { %2611 = vtanh.f32 %v1773_v48 }
 0x787   : > { %v2606_v31 = vpop.eup %2605 }
 0x788   : > { %v2608_v50 = vpop.eup %2607  ;;  %v1778_v52 = vadd.f32 1.0, %v2606_v31 }
 0x789   : > { %v1784_v53 = vadd.f32 1.0, %v2608_v50  ;;  %v2610_v37 = vpop.eup %2609 }
 0x78a   : > { %2613 = vrcp.f32 %v1778_v52  ;;  %v2612_v60 = vpop.eup %2611  ;;  %v1791_v0 = vadd.f32 1.0, %v2610_v37  ;;  %v1997_v52 = vstv %s1996_s17 }
 0x78b   : > { %2615 = vrcp.f32 %v1784_v53  ;;  %vm1998_vm7 = vcmp.eq.s32.totalorder %v1997_v52, 1 }
 0x78c   : > { %2617 = vrcp.f32 %v1791_v0 }
 0x794   : > { %v2614_v41 = vpop.eup %2613 }
 0x795   : > { %v2616_v35 = vpop.eup %2615  ;;  %v1795_v58 = vmul.f32 %v2614_v41, %v2612_v60 }
 0x796   : > { %v1794_v36 = vmul.f32 %v2616_v35, %v3656_v40  ;;  %v2618_v61 = vpop.eup %2617 }
 0x798   : > { %v1796_v54 = vadd.f32 %v1795_v58, %v1794_v36 }
 0x79a   : > { %2619 = vtanh.f32 %v1796_v54  ;;  %v3721_v62 = vsel %vm1803_vm6, %v1796_v54, %v3656_v40 }
 0x7a4   : > { %v2620_v56 = vpop.eup %2619 }
 0x7a5   : > { %v1798_v2 = vmul.f32 %v2620_v56, %v2618_v61 }
 0x7a7   : > { %v3724_v46 = vsel %vm1803_vm6, %v1798_v2, %v3659_v8 }
 0x7a8   : > { %v1807_v47 = vcombine.high %v3724_v46, %v3724_v46  ;;  %v1814_v49 = vrot.slane %v3724_v46, %v3257_v38  ;;  %v1883_v44 = vpack.c.bf16 %v3724_v46, %v3724_v46 }
 0x7aa   : > { %v1821_v40 = vrot.slane %v1807_v47, %v3257_v38  ;;  %v1822_v59 = vcombine.high %v1814_v49, %v1814_v49  ;;  %v1830_v34 = vrot.slane %v1814_v49, %v3257_v38  ;;  %2342 = vst.sshfl [vmem:[%s3086_s25 + $0x6] sm:$0x1 pattern:$0x73625140] %v1814_v49  ;;  %1917 = vmatmul.mubr.bf16.vlgmr.msra.gmra.mrb[28].mxu0 %v1883_v44 }
 0x7ab   : > { %1958 = vmatmul.mubr.bf16.vlgmr.msra.gmra.mrb[28].mxu1 %v1883_v44 }
 0x7ac   : > { %v1823_v8 = vcombine.high %v1821_v40, %v1821_v40  ;;  %v1837_v6 = vrot.slane %v1821_v40, %v3257_v38  ;;  %v1844_v39 = vrot.slane %v1822_v59, %v3257_v38  ;;  %v1852_v9 = vcombine.high %v1830_v34, %v1830_v34  ;;  %2343 = vst.sshfl [vmem:[%s3086_s25 + $0xe] sm:$0x1 pattern:$0x73625140] %v1822_v59 }
 0x7ad   : > { %2344 = vst.sshfl [vmem:[%s3086_s25 + $0x26] sm:$0x1 pattern:$0x73625140] %v1821_v40 }
 0x7ae   : > { %v1851_v10 = vrot.slane %v1823_v8, %v3257_v38  ;;  %v1853_v13 = vcombine.high %v1837_v6, %v1837_v6  ;;  %v1854_v57 = vcombine.high %v1844_v39, %v1844_v39  ;;  %1866 = vst [vmem:[%s3086_s25 + $0x16] sm:$0x1] %v1852_v9  ;;  %2345 = vst.sshfl [vmem:[%s3086_s25 + $0x2e] sm:$0x1 pattern:$0x73625140] %v1823_v8 }
 0x7b0   : > { %v1855_v42 = vcombine.high %v1851_v10, %v1851_v10  ;;  %1867 = vst [vmem:[%s3086_s25 + $0x1e] sm:$0x1] %v1854_v57  ;;  %1870 = vst [vmem:[%s3086_s25 + $0x36] sm:$0x1] %v1853_v13 }
 0x7b2   : > { %1871 = vst [vmem:[%s3086_s25 + $0x3e] sm:$0x1] %v1855_v42 }
 0x87d   : > { %v1918_v12 = vpop.f32.mrb[28].mxu0 }
 0x87e   : > { %v1959_v14 = vpop.f32.mrb[28].mxu1  ;;  %v1966_v16 = vadd.f32 %v1918_v12, %v1879_v4  ;;  %v1920_v17 = vpop.f32.mrb[29].mxu0 }
 0x87f   : > { %v1961_v18 = vpop.f32.mrb[29].mxu1  ;;  %v1967_v19 = vadd.f32 %v1920_v17, %v1880_v11  ;;  %v1922_v20 = vpop.f32.mrb[30].mxu0  ;;  %v1968_v27 = vadd.f32 %v1959_v14, %v1881_v25 }
 0x880   : > { %v1963_v1 = vpop.f32.mrb[30].mxu1  ;;  %v2348_v21 = vmul.f32 -1.442695, %v1966_v16  ;;  %v1923_v7 = vpop.f32.mrb[31].mxu0  ;;  %v1969_v45 = vadd.f32 %v1961_v18, %v1882_v24 }
 0x881   : > { %v1964_v22 = vpop.f32.mrb[31].mxu1  ;;  %v2349_v23 = vmul.f32 -1.442695, %v1967_v19 }
 0x882   : > { %2621 = vpow2.f32 %v2348_v21  ;;  %v2350_v26 = vmul.f32 -1.442695, %v1969_v45 }
 0x883   : > { %2623 = vpow2.f32 %v2349_v23 }
 0x884   : > { %2625 = vpow2.f32 %v2350_v26 }
 0x885   : > { %2627 = vtanh.f32 %v1968_v27 }
 0x88c   : > { %v2622_v28 = vpop.eup %2621 }
 0x88d   : > { %v2624_v29 = vpop.eup %2623  ;;  %v1973_v30 = vadd.f32 1.0, %v2622_v28 }
 0x88e   : > { %v1979_v48 = vadd.f32 1.0, %v2624_v29  ;;  %v2626_v51 = vpop.eup %2625 }
 0x88f   : > { %2629 = vrcp.f32 %v1973_v30  ;;  %v2628_v31 = vpop.eup %2627  ;;  %v1986_v63 = vadd.f32 1.0, %v2626_v51 }
 0x890   : > { %2631 = vrcp.f32 %v1979_v48 }
 0x891   : > { %2633 = vrcp.f32 %v1986_v63 }
 0x899   : > { %v2630_v50 = vpop.eup %2629 }
 0x89a   : > { %v2632_v53 = vpop.eup %2631  ;;  %v1990_v37 = vmul.f32 %v2630_v50, %v2628_v31 }
 0x89b   : > { %v1989_v60 = vmul.f32 %v2632_v53, %v3721_v62  ;;  %v2634_v35 = vpop.eup %2633 }
 0x89d   : > { %v1991_v41 = vadd.f32 %v1990_v37, %v1989_v60 }
 0x89f   : > { %2635 = vtanh.f32 %v1991_v41  ;;  %v1999_v55 = vsel %vm1998_vm7, %v1991_v41, %v3721_v62 }
 0x8a0   : > { %2068 = vst [vmem:[#allocation3] sm:$0xff] %v1999_v55  ;;  %2074 = vst [vmem:[#allocation12] sm:$0xff] (!%p2355_p2), %v1999_v55 }
 0x8a9   : > { %v2636_v58 = vpop.eup %2635 }
 0x8aa   : > { %v1993_v0 = vmul.f32 %v2636_v58, %v2634_v35 }
 0x8ac   : > { %v2000_v36 = vsel %vm1998_vm7, %v1993_v0, %v3724_v46 }
 0x8ad   : > { %v2002_v54 = vcombine.high %v2000_v36, %v2000_v36  ;;  %v2009_v61 = vrot.slane %v2000_v36, %v3257_v38  ;;  %2067 = vst [vmem:[#allocation2] sm:$0xff] %v2000_v36  ;;  %2073 = vst [vmem:[#allocation10] sm:$0xff] (!%p2355_p2), %v2000_v36 }
 0x8af   : > { %v2016_v56 = vrot.slane %v2002_v54, %v3257_v38  ;;  %v2017_v2 = vcombine.high %v2009_v61, %v2009_v61  ;;  %v2025_v62 = vrot.slane %v2009_v61, %v3257_v38  ;;  %2351 = vst.sshfl [vmem:[%s3086_s25 + $0x7] sm:$0x1 pattern:$0x73625140] %v2009_v61 }
 0x8b1   : > { %v2018_v47 = vcombine.high %v2016_v56, %v2016_v56  ;;  %v2032_v49 = vrot.slane %v2016_v56, %v3257_v38  ;;  %v2039_v46 = vrot.slane %v2017_v2, %v3257_v38  ;;  %v2047_v44 = vcombine.high %v2025_v62, %v2025_v62  ;;  %2352 = vst.sshfl [vmem:[%s3086_s25 + $0xf] sm:$0x1 pattern:$0x73625140] %v2017_v2  ;;  %2072 = sbr.rel (%p2355_p2) target bundleno = 2232 (0x8b8), region = 48 }
 0x8b2   : > { %2353 = vst.sshfl [vmem:[%s3086_s25 + $0x27] sm:$0x1 pattern:$0x73625140] %v2016_v56 }
 0x8b3   : > { %v2046_v40 = vrot.slane %v2018_v47, %v3257_v38  ;;  %v2048_v59 = vcombine.high %v2032_v49, %v2032_v49  ;;  %v2049_v34 = vcombine.high %v2039_v46, %v2039_v46  ;;  %2061 = vst [vmem:[%s3086_s25 + $0x17] sm:$0x1] %v2047_v44  ;;  %2354 = vst.sshfl [vmem:[%s3086_s25 + $0x2f] sm:$0x1 pattern:$0x73625140] %v2018_v47 }
 0x8b5   : > { %v2050_v8 = vcombine.high %v2046_v40, %v2046_v40  ;;  %2062 = vst [vmem:[%s3086_s25 + $0x1f] sm:$0x1] %v2049_v34  ;;  %2065 = vst [vmem:[%s3086_s25 + $0x37] sm:$0x1] %v2048_v59 }
 0x8b7   : > { %2066 = vst [vmem:[%s3086_s25 + $0x3f] sm:$0x1] %v2050_v8 }
 0x8b8 PF: > { %s2878_s10 = smov [#allocation10]   ;;  %s2357_s7 = sshll.u32 %s2861_s21, 7 }
 0x8b9   : > { %s2107_s12 = sshll.u32 %s2878_s10, 4  ;;  %p3893_p7 = scmp.ne.s32.totalorder %s3879_s27, 0  ;;  %s2108_s12 = int_to_ptr.vmem [resolvable:$true] %s2107_s12 }
 0x8ba   : > { %s2727_s24 = scalar_lea.vmem %s2108_s12, 128  ;;  %p2734_p6 = scmp.lt.s32.totalorder %s2108_s12, %s2108_s12 }
 0x8bb   : > { %p2728_p3 = scmp.ne.s32.totalorder %s2108_s12, %s2727_s24  ;;  %p2735_p8 = scmp.lt.s32.totalorder %s2727_s24, %s2727_s24 }
 0x8bd   : > { %p2729_p13 = pnand %p2728_p3, %p3893_p7  ;;  %p2736_p12 = por %p2735_p8, %p2734_p6 }
 0x8bf   : > { %p2730_p4 = pneg %p2729_p13 }
 0x8c1   : > { %p2737_p10 = pnand %p2736_p12, %p2730_p4 }
 0x8c3   : > { %2740 = shalt.err (!%p2737_p10)
}
 0x8c4   : > { %s2741_s28 = scalar_lea.hbm %s3869_s4, 128 }
 0x8c5   : > { %p2742_p0 = scmp.ne.s32.totalorder %s3869_s4, %s2741_s28  ;;  %p2747_p1 = scmp.lt.u32.totalorder %s2741_s28, %s3869_s4 }
 0x8c7   : > { %p2743_p5 = pnand %p2742_p0, %p3893_p7 }
 0x8c9   : > { %p2744_p9 = pneg %p2743_p5 }
 0x8cb   : > { %p2749_p2 = pnand %p2747_p1, %p2744_p9 }
 0x8cd   : > { %2752 = shalt.err (!%p2749_p2)
}
 0x8ce   : > { %2374 = dma.vmem_to_hbm [thread:$0]  (%p3893_p7), %s2108_s12, 128, %s3869_s4, [#allocation11]  }
 0x8cf   : > { %s3792_s30 = scalar_lea.hbm %s3868_s3, %s2357_s7  ;;  %s2091_s26 = sshll.u32 %s3086_s25, 4  ;;  %s3795_s26 = int_to_ptr.vmem [resolvable:$true] %s2091_s26 }
 0x8d0   : > { %s2076_s28 = scalar_lea.sflag [#allocation6], %s3071_s6  ;;  %s2753_s13 = scalar_lea.vmem %s3795_s26, 1024 }
 0x8d1   : > { %p2754_p3 = scmp.ne.s32.totalorder %s3795_s26, %s2753_s13  ;;  %s2879_s11 = smov [#allocation9]  }
 0x8d2   : > { %s2757_s21 = sshll.u32 %s2879_s11, 4  ;;  %s2758_s21 = int_to_ptr.vmem [resolvable:$false] %s2757_s21 }
 0x8d3   : > { %p2755_p13 = pnand %p2754_p3, %p3012_p11  ;;  %s2759_s12 = scalar_lea.vmem %s2758_s21, 2048 }
 0x8d4   : > { %p2760_p6 = scmp.lt.s32.totalorder %s3795_s26, %s2758_s21  ;;  %p2761_p8 = scmp.lt.s32.totalorder %s2759_s12, %s2753_s13 }
 0x8d5   : > { %p2756_p4 = pneg %p2755_p13 }
 0x8d6   : > { %p2762_p12 = por %p2761_p8, %p2760_p6 }
 0x8d8   : > { %p2763_p10 = pnand %p2762_p12, %p2756_p4 }
 0x8da   : > { %2766 = shalt.err (!%p2763_p10)
}
 0x8db   : > { %s2767_s25 = scalar_lea.hbm %s3792_s30, 1024  ;;  %s2771_s14 = scalar_lea.hbm %s3868_s3, 3072 }
 0x8dc   : > { %p2768_p0 = scmp.ne.s32.totalorder %s3792_s30, %s2767_s25  ;;  %p2772_p1 = scmp.lt.u32.totalorder %s3792_s30, %s3868_s3 }
 0x8dd   : > { %p2773_p2 = scmp.lt.u32.totalorder %s2771_s14, %s2767_s25  ;;  %p2775_p13 = scmp.lt.u32.totalorder %s2767_s25, %s3792_s30 }
 0x8de   : > { %p2769_p5 = pnand %p2768_p0, %p3012_p11 }
 0x8df   : > { %p2774_p3 = por %p2773_p2, %p2772_p1 }
 0x8e0   : > { %p2770_p9 = pneg %p2769_p5 }
 0x8e1   : > { %p2776_p4 = por %p2775_p13, %p2774_p3 }
 0x8e3   : > { %p2777_p6 = pnand %p2776_p4, %p2770_p9 }
 0x8e5   : > { %2780 = shalt.err (!%p2777_p6)
}
 0x8e6   : > { %s2880_s24 = smov 128   ;;  %s2881_s13 = smov 384  }
 0x8e7   : > { %s2882_s11 = smov 8   ;;  %s2883_s21 = smov [#allocation12]  }
 0x8e8   : > { %2372 = dma.vmem_to_hbm [thread:$0]  (%p3012_p11), %s3795_s26, 1024, %s3792_s30, %s2076_s28, %s2880_s24, %s2881_s13, %s2882_s11  }
 0x8e9   : > { %s2120_s12 = sshll.u32 %s2883_s21, 4  ;;  %s2121_s12 = int_to_ptr.vmem [resolvable:$true] %s2120_s12 }
 0x8ea   : > { %s2781_s7 = scalar_lea.vmem %s2121_s12, 128  ;;  %p2788_p0 = scmp.lt.s32.totalorder %s2121_s12, %s2121_s12 }
 0x8eb   : > { %p2782_p8 = scmp.ne.s32.totalorder %s2121_s12, %s2781_s7  ;;  %p2789_p5 = scmp.lt.s32.totalorder %s2781_s7, %s2781_s7 }
 0x8ed   : > { %p2783_p12 = pnand %p2782_p8, %p3893_p7  ;;  %p2790_p9 = por %p2789_p5, %p2788_p0 }
 0x8ef   : > { %p2784_p10 = pneg %p2783_p12 }
 0x8f1   : > { %p2791_p1 = pnand %p2790_p9, %p2784_p10 }
 0x8f3   : > { %2794 = shalt.err (!%p2791_p1)
}
 0x8f4   : > { %s2795_s8 = scalar_lea.hbm %s3870_s5, 128 }
 0x8f5   : > { %p2796_p11 = scmp.ne.s32.totalorder %s3870_s5, %s2795_s8  ;;  %p2801_p13 = scmp.lt.u32.totalorder %s2795_s8, %s3870_s5 }
 0x8f7   : > { %p2797_p2 = pnand %p2796_p11, %p3893_p7 }
 0x8f9   : > { %p2798_p3 = pneg %p2797_p2 }
 0x8fb   : > { %p2803_p4 = pnand %p2801_p13, %p2798_p3 }
 0x8fd   : > { %2806 = shalt.err (!%p2803_p4)
}
 0x8fe   : > { %2376 = dma.vmem_to_hbm [thread:$0]  (%p3893_p7), %s2121_s12, 128, %s3870_s5, [#allocation11]  }
 0x8ff   : > { %2840 = dma.done.wait (%p3893_p7), [#allocation11], 256  }
 0x900   : > { %2842 = vsyncadd (%p3893_p7), [#allocation11], 4294967040 }
 0x901 PF: > { %p2401_p6 = scmp.ge.s32.totalorder %s2869_s23, 2  ;;  %s2140_s10 = sand.u32 1, %s2849_s18  }
 0x902   : > { %p3894_p8 = scmp.ne.s32.totalorder %s3881_s29, 0  ;;  %s2141_s24 = scalar_lea.sflag [#allocation6], %s2140_s10 }
 0x904   : > { %p2391_p12 = pnand %p2401_p6, %p3894_p8 }
 0x906   : > { %2844 = dma.done.wait (!%p2391_p12), %s2141_s24, 1024  }
 0x907   : > { %2846 = vsyncadd (!%p2391_p12), %s2141_s24, 4294966272  ;;  %s24_s23 = sadd.s32 1, %s2869_s23   ;;  %s3895_s18 = smov %s2853_s19 }
 0x908   : > { %p21_p10 = scmp.ge.s32.totalorder %s24_s23, 5   ;;  %s3896_s19 = smov %s2857_s20 }
 0x909   : > { %s3897_s20 = smov %s3021_s15  ;;  %s3898_s21 = smov %s2865_s22 }
 0x90a   : > { %s3899_s22 = smov %s3901_s9  ;;  %23 = sbr.rel (!%p21_p10) target bundleno = 8 (0x8), region = 114 }
 0x911   :  { %2146 = vsyncpa [#allocation5], 1 }
 0x912   :  { %2148 = vsyncpa [#allocation5 + $0x1], 1 }
 0x913   :  { %2149 = vsyncpa [#allocation8], 1 }
 0x914   :  { %2150 = vsyncpa [#allocation6], 1 }
 0x915   :  { %2152 = vsyncpa [#allocation6 + $0x1], 1 }
 0x916   :  { %2153 = vsyncpa [#allocation11], 1 }

</bundles_post_ra>
